<compile_context>
chip_gen: v7x
topology: tpu7x:2x2x1
jax: 0.10.0
libtpu: 0.0.40
codegen_flags: <defaults>
</compile_context>

<pallas_src>
import numpy as np
import jax
import jax.numpy as jnp
from jax.experimental import pallas as pl
from jax.experimental.pallas import tpu as pltpu

# ----------------------------- model dims -----------------------------------
B = 2            # batch
INITIAL_DIM = 4  # initial_dim (data dim of `initial`)
D_H = 8          # func_inputdim (hidden RDE state h)
D_L = 8          # from_logsig_dim
D_E = 8          # emb_dim (emb_dim_factor = 8)
OUT_DIM = 4      # output_dim
HID = 32         # hidden width of every 2-layer MLP (layers_dim = (32,))
L_SEQ = 8        # number of log-signature intervals
STEP_SIZE = 1.0  # step_size (euler)

SUB = 8          # sublane padding of the batch dim (one batch tile per grid step)
LANE = 128       # lane width of every packed slab
HID2 = 2 * HID   # 64  : fused [enc_hidden | mf_hidden] width
DHE = D_H + D_E  # 16  : fused carry [h | e] width
ENC_W = D_E * D_L  # 64 : flattened encoder output (= mf width D_H*D_E)

# ---------------- packed-parameter row layout (all 8-row aligned) -------------
R_WI1 = 0                  # (LANE, HID2)  fused initial_function/initial_encoder layer-1
R_WI2 = R_WI1 + LANE       # (HID2, DHE)   fused init layer-2  -> he0 = [h0 | e0]
R_WV1 = R_WI2 + HID2       # (DHE, HID2)   fused vector-field layer-1
R_WV2 = R_WV1 + DHE        # (HID2, LANE)  fused vector-field layer-2 -> [enc | mf]
R_SE2 = R_WV2 + HID2       # (LANE, LANE)  segment-sum + replicate: det & det_rep
R_SH = R_SE2 + LANE        # (LANE, DHE)   segment-sum over e -> dht
R_WO1 = R_SH + LANE        # (DHE, HID)    final_linear layer-1 (e rows zeroed)
R_WO2 = R_WO1 + DHE        # (HID, OUT_DIM)
R_BI1 = R_WO2 + HID        # (SUB, HID2)   sublane-broadcast biases from here on
R_BI2 = R_BI1 + SUB        # (SUB, DHE)
R_BV1 = R_BI2 + SUB        # (SUB, HID2)
R_BV2 = R_BV1 + SUB        # (SUB, LANE)
R_BO1 = R_BV2 + SUB        # (SUB, HID)
R_BO2 = R_BO1 + SUB        # (SUB, OUT_DIM)
N_ROWS = R_BO2 + SUB       # 624 rows -> ~320 KB of f32 params in VMEM


# --------------------- single fused EmbRDE forward kernel --------------------
def _emb_rde_fused_kernel(data_ref, params_ref, out_ref):
    f32 = jnp.float32
    dot = lambda a, b: jnp.dot(a, b, preferred_element_type=f32)
    P = params_ref
    n_steps = data_ref.shape[0] - 1

    # Only the (tiny) broadcast biases of the per-step MLPs are hoisted into vregs;
    # weight / constant matrices are read from VMEM inside the loop.
    bv1 = P[R_BV1:R_BV1 + SUB, 0:HID2]          # (8, 64)
    bv2 = P[R_BV2:R_BV2 + SUB, :]               # (8, 128)

    # ---- fused initial_function ('fc_x') + initial_encoder ('fc_logsig') ----
    # x0 lanes: [initial(4) | 0(4) | logsig_0(8) | 0...]; one Linear->ReLU->Linear pair.
    x0 = data_ref[0]                                                   # (8, 128)
    hid0 = jnp.maximum(dot(x0, P[R_WI1:R_WI1 + LANE, 0:HID2])
                       + P[R_BI1:R_BI1 + SUB, 0:HID2], 0.0)            # (8, 64)
    he = dot(hid0, P[R_WI2:R_WI2 + HID2, 0:DHE]) \
        + P[R_BI2:R_BI2 + SUB, 0:DHE]                                  # (8, 16) = [h0 | e0]

    # ---- fixed-step Euler log-ODE integration (rdeint, solver='euler', step=1) ----
    def step(t, he):
        ls_rep = data_ref[1 + t]                                       # (8, 128), ls tiled
        # Fused block-diagonal encoder/main_func (BaseFunc1: Linear -> Tanh -> Linear)
        hid = jnp.tanh(dot(he, P[R_WV1:R_WV1 + DHE, 0:HID2]) + bv1)    # (8, 64)
        comb = dot(hid, P[R_WV2:R_WV2 + HID2, :]) + bv2                # (8, 128) = [enc|mf]
        # One matmul does both torch.bmm #1 (det segment-sum over l) AND the lane
        # replication of det into the mf layout:
        #   det_slab lanes 8..15 = det, lanes 64..127 = det[(j-64) % D_E], rest 0.
        det_slab = dot(comb * ls_rep, P[R_SE2:R_SE2 + LANE, :])        # (8, 128)
        # torch.bmm #2: dht[b,h] = sum_e mf[b, h*D_E+e] * det[b,e]; SH zeroes all
        # non-mf rows, so the enc lanes of comb*det_slab cannot contaminate dht.
        dhe = dot(comb * det_slab, P[R_SH:R_SH + LANE, 0:DHE]) \
            + det_slab[:, 0:DHE]                                       # (8,16) = [dht|det]
        return he + STEP_SIZE * dhe

    he = jax.lax.fori_loop(0, n_steps, step, he, unroll=True)

    # ---- final_linear (_Initial_part): Linear -> ReLU -> Linear on h ----
    oh = jnp.maximum(dot(he, P[R_WO1:R_WO1 + DHE, 0:HID])
                     + P[R_BO1:R_BO1 + SUB, 0:HID], 0.0)               # (8, 32)
    out = dot(oh, P[R_WO2:R_WO2 + HID, 0:OUT_DIM]) \
        + P[R_BO2:R_BO2 + SUB, 0:OUT_DIM]                              # (8, 4)
    out_ref[...] = out.astype(out_ref.dtype)


# --------------------------- parameter construction --------------------------
def _linear_params(key, fan_in, fan_out):
    # matches torch.nn.Linear default init (uniform +-1/sqrt(fan_in)), deterministic
    k1, k2 = jax.random.split(key)
    bound = 1.0 / np.sqrt(fan_in)
    w = jax.random.uniform(k1, (fan_in, fan_out), jnp.float32, -bound, bound)
    b = jax.random.uniform(k2, (1, fan_out), jnp.float32, -bound, bound)
    return w, b


def make_params(key):
    keys = jax.random.split(key, 10)
    # initial_function: _Initial('fc_x') -> _Initial_part(INITIAL_DIM -> D_H), ReLU inside
    wf1, bf1 = _linear_params(keys[0], INITIAL_DIM, HID)
    wf2, bf2 = _linear_params(keys[1], HID, D_H)
    # initial_encoder: _Initial('fc_logsig') -> _Initial_part(D_L -> D_E), ReLU inside
    we1, be1 = _linear_params(keys[2], D_L, HID)
    we2, be2 = _linear_params(keys[3], HID, D_E)
    # final_linear: _Initial_part(D_H -> OUT_DIM), ReLU inside
    wo1, bo1 = _linear_params(keys[4], D_H, HID)
    wo2, bo2 = _linear_params(keys[5], HID, OUT_DIM)
    # Wrapper.encoder: BaseFunc1(D_E, D_E, D_L): Linear(D_E,HID)->Tanh->Linear(HID, D_E*D_L)
    wE1, bE1 = _linear_params(keys[6], D_E, HID)
    wE2, bE2 = _linear_params(keys[7], HID, D_E * D_L)
    # Wrapper.main_func: BaseFunc1(D_H, D_H, D_E): Linear(D_H,HID)->Tanh->Linear(HID, D_H*D_E)
    wM1, bM1 = _linear_params(keys[8], D_H, HID)
    wM2, bM2 = _linear_params(keys[9], HID, D_H * D_E)
    return {
        "ifunc": (wf1, bf1, wf2, bf2),
        "ienc": (we1, be1, we2, be2),
        "final": (wo1, bo1, wo2, bo2),
        "vf_raw": (wE1, bE1, wE2, bE2, wM1, bM1, wM2, bM2),
    }


def pack_params(p):
    """Pack every weight / bias / constant matrix into ONE (N_ROWS, 128) f32 array."""
    wf1, bf1, wf2, bf2 = map(np.asarray, p["ifunc"])
    we1, be1, we2, be2 = map(np.asarray, p["ienc"])
    wo1, bo1, wo2, bo2 = map(np.asarray, p["final"])
    wE1, bE1, wE2, bE2, wM1, bM1, wM2, bM2 = map(np.asarray, p["vf_raw"])

    P = np.zeros((N_ROWS, LANE), np.float32)
    bc = lambda b: np.broadcast_to(b, (SUB, b.shape[-1]))  # (1,N) -> (SUB,N) sublane bcast

    # fused initial MLPs: x0 lanes 0..3 = initial, lanes 8..15 = logsig_0
    P[R_WI1:R_WI1 + INITIAL_DIM, 0:HID] = wf1
    P[R_WI1 + D_H:R_WI1 + D_H + D_L, HID:HID2] = we1
    P[R_BI1:R_BI1 + SUB, 0:HID] = bc(bf1)
    P[R_BI1:R_BI1 + SUB, HID:HID2] = bc(be1)
    P[R_WI2:R_WI2 + HID, 0:D_H] = wf2
    P[R_WI2 + HID:R_WI2 + HID2, D_H:DHE] = we2
    P[R_BI2:R_BI2 + SUB, 0:D_H] = bc(bf2)
    P[R_BI2:R_BI2 + SUB, D_H:DHE] = bc(be2)

    # fused vector-field layer 1: he=[h|e] -> hid=[enc_hid|mf_hid]
    P[R_WV1 + D_H:R_WV1 + DHE, 0:HID] = wE1       # e contributes to enc_hid
    P[R_WV1:R_WV1 + D_H, HID:HID2] = wM1          # h contributes to mf_hid
    P[R_BV1:R_BV1 + SUB, 0:HID] = bc(bE1)
    P[R_BV1:R_BV1 + SUB, HID:HID2] = bc(bM1)
    # fused vector-field layer 2: hid -> comb=[enc(64)|mf(64)]
    P[R_WV2:R_WV2 + HID, 0:ENC_W] = wE2
    P[R_WV2 + HID:R_WV2 + HID2, ENC_W:LANE] = wM2
    P[R_BV2:R_BV2 + SUB, 0:ENC_W] = bc(bE2)
    P[R_BV2:R_BV2 + SUB, ENC_W:LANE] = bc(bM2)

    # constant segment-sum / replicate matrices (row-major .view indexing of the bmms)
    se_core = np.kron(np.eye(D_E, dtype=np.float32),
                      np.ones((D_L, 1), np.float32))              # (64, D_E): e-segment sum
    P[R_SE2:R_SE2 + ENC_W, D_H:DHE] = se_core                     # -> det in lanes 8..15
    P[R_SE2:R_SE2 + ENC_W, ENC_W:LANE] = np.tile(se_core, (1, D_H))  # -> det_rep over mf lanes
    sh_core = np.kron(np.eye(D_H, dtype=np.float32),
                      np.ones((D_E, 1), np.float32))              # (64, D_H): h-segment sum
    P[R_SH + ENC_W:R_SH + LANE, 0:D_H] = sh_core

    # final_linear (rows 8..15 of wo1 stay zero so `he` can be used directly)
    P[R_WO1:R_WO1 + D_H, 0:HID] = wo1
    P[R_BO1:R_BO1 + SUB, 0:HID] = bc(bo1)
    P[R_WO2:R_WO2 + HID, 0:OUT_DIM] = wo2
    P[R_BO2:R_BO2 + SUB, 0:OUT_DIM] = bc(bo2)
    return jnp.asarray(P)


# ------------------------------ EmbRDE forward -------------------------------
def emb_rde_forward(x, packed_params):
    """EmbRDE.forward(x, emb_mode=False): returns `outputs` of shape (B, OUT_DIM)."""
    initial, all_data, from_logsig, to_logsig = x
    del all_data, to_logsig  # unused in the non-emb inference path

    bq = initial.shape[0]
    seq_len = from_logsig.shape[1]
    n_tiles = pl.cdiv(bq, SUB)
    bp = n_tiles * SUB
    pad = bp - bq

    init_p = jnp.pad(initial.astype(jnp.float32), ((0, pad), (0, 0)))          # (bp, 4)
    ls = jnp.pad(from_logsig.astype(jnp.float32), ((0, pad), (0, 0), (0, 0)))  # (bp, L, D_L)
    ls_seq = jnp.transpose(ls, (1, 0, 2))                                      # (L, bp, D_L)

    # DATA row 0: fused init-MLP input slab  [initial | 0 | logsig_0 | 0...]
    x0 = jnp.zeros((bp, LANE), jnp.float32)
    x0 = x0.at[:, :INITIAL_DIM].set(init_p)
    x0 = x0.at[:, D_H:D_H + D_L].set(ls_seq[0])
    # DATA rows 1..L: log-signature lane-replicated into the enc layout (hoisted out
    # of the time loop — one cheap XLA tile instead of 8 in-kernel MXU matmuls).
    ls_rep = jnp.tile(ls_seq, (1, 1, D_E))                                     # (L, bp, 64)
    ls_rep = jnp.pad(ls_rep, ((0, 0), (0, 0), (0, LANE - ENC_W)))              # (L, bp, 128)
    data = jnp.concatenate([x0[None], ls_rep], axis=0)                         # (L+1, bp, 128)

    out_pad = pl.pallas_call(
        _emb_rde_fused_kernel,
        out_shape=jax.ShapeDtypeStruct((bp, OUT_DIM), jnp.float32),
        grid=(n_tiles,),
        in_specs=[
            pl.BlockSpec((seq_len + 1, SUB, LANE), lambda i: (0, i, 0)),
            pl.BlockSpec((N_ROWS, LANE), lambda i: (0, 0)),
        ],
        out_specs=pl.BlockSpec((SUB, OUT_DIM), lambda i: (i, 0)),
        compiler_params=pltpu.CompilerParams(dimension_semantics=("parallel",)),
        cost_estimate=pl.CostEstimate(flops=4_000_000, transcendentals=4_096,
                                      bytes_accessed=400_000),
    )(data, packed_params)
    return out_pad[:bq]


# ------------------------------- pure-JAX reference --------------------------
def _reference_forward(x, p):
    initial, _, from_logsig, _ = x

    def mlp_ref(v, w1, b1, w2, b2, act):
        h = v @ w1 + b1
        h = jnp.maximum(h, 0.0) if act == "relu" else jnp.tanh(h)
        return h @ w2 + b2

    e = mlp_ref(from_logsig[:, 0], *p["ienc"], "relu")
    h = mlp_ref(initial, *p["ifunc"], "relu")
    wE1, bE1, wE2, bE2, wM1, bM1, wM2, bM2 = p["vf_raw"]
    for i in range(from_logsig.shape[1]):
        ls = from_logsig[:, i]
        enc = mlp_ref(e, wE1, bE1, wE2, bE2, "tanh").reshape(-1, D_E, D_L)
        det = jnp.einsum("bel,bl->be", enc, ls)
        mf = mlp_ref(h, wM1, bM1, wM2, bM2, "tanh").reshape(-1, D_H, D_E)
        dh = jnp.einsum("bhe,be->bh", mf, det)
        h = h + STEP_SIZE * dh
        e = e + STEP_SIZE * det
    return mlp_ref(h, *p["final"], "relu")


# ----------------------------------- main ------------------------------------
if __name__ == "__main__":
    key = jax.random.PRNGKey(0)
    k_param, k_init, k_data, k_from, k_to = jax.random.split(key, 5)

    params = make_params(k_param)
    packed = pack_params(params)

    initial = jax.random.normal(k_init, (B, INITIAL_DIM), jnp.float32)
    all_data = jax.random.normal(k_data, (B, L_SEQ + 1, INITIAL_DIM), jnp.float32)
    from_logsig = 0.1 * jax.random.normal(k_from, (B, L_SEQ, D_L), jnp.float32)
    to_logsig = 0.1 * jax.random.normal(k_to, (B, L_SEQ, D_L), jnp.float32)
    x = (initial, all_data, from_logsig, to_logsig)

    out = jax.jit(emb_rde_forward)(x, packed)
    out = jax.block_until_ready(out)

    ref = _reference_forward(x, params)
    np.testing.assert_allclose(np.asarray(out), np.asarray(ref), rtol=1e-4, atol=1e-4)

    print("KERNEL_OK")
</pallas_src>

<mosaic_0001>
module attributes {stable_mosaic.version = 11 : i64} {
  func.func @_emb_rde_fused_kernel(%arg0: i32, %arg1: memref<9x8x128xf32, #tpu.memory_space<vmem>>, %arg2: memref<624x128xf32, #tpu.memory_space<vmem>>, %arg3: memref<8x4xf32, #tpu.memory_space<vmem>>) attributes {dimension_semantics = [#tpu.dimension_semantics<parallel>], iteration_bounds = array<i64: 1>, scalar_prefetch = 0 : i64, scratch_operands = 0 : i64, tpu.core_type = #tpu.core_type<tc>, window_params = [{transform_indices = @transform_0, window_bounds = array<i64: 9, 8, 128>}, {pipeline_mode = #tpu.pipeline_mode<synchronous>, transform_indices = @transform_1, window_bounds = array<i64: 624, 128>}, {transform_indices = @transform_2, window_bounds = array<i64: 8, 4>}]} {
    %c592 = arith.constant 592 : index
    %c0 = arith.constant 0 : index
    %0 = vector.load %arg2[%c592, %c0] : memref<624x128xf32, #tpu.memory_space<vmem>>, vector<8x64xf32>
    %c600 = arith.constant 600 : index
    %c0_0 = arith.constant 0 : index
    %1 = vector.load %arg2[%c600, %c0_0] : memref<624x128xf32, #tpu.memory_space<vmem>>, vector<8x128xf32>
    %c0_1 = arith.constant 0 : index
    %c0_2 = arith.constant 0 : index
    %c0_3 = arith.constant 0 : index
    %2 = vector.load %arg1[%c0_1, %c0_2, %c0_3] : memref<9x8x128xf32, #tpu.memory_space<vmem>>, vector<1x8x128xf32>
    %3 = vector.shape_cast %2 : vector<1x8x128xf32> to vector<8x128xf32>
    %c0_4 = arith.constant 0 : index
    %c0_5 = arith.constant 0 : index
    %4 = vector.load %arg2[%c0_4, %c0_5] : memref<624x128xf32, #tpu.memory_space<vmem>>, vector<128x64xf32>
    %cst = arith.constant dense<0.000000e+00> : vector<8x64xf32>
    %5 = tpu.matmul %3, %4, %cst {dimension_numbers = #tpu.dot_dimension_numbers<[1], [0], [0], [1], [0, 0, 1, 1], [], []>} : vector<8x128xf32>, vector<128x64xf32>, vector<8x64xf32> -> vector<8x64xf32>
    %c576 = arith.constant 576 : index
    %c0_6 = arith.constant 0 : index
    %6 = vector.load %arg2[%c576, %c0_6] : memref<624x128xf32, #tpu.memory_space<vmem>>, vector<8x64xf32>
    %7 = arith.addf %5, %6 : vector<8x64xf32>
    %cst_7 = arith.constant 0.000000e+00 : f32
    %8 = vector.broadcast %cst_7 : f32 to vector<8x64xf32>
    %9 = arith.maximumf %7, %8 : vector<8x64xf32>
    %c128 = arith.constant 128 : index
    %c0_8 = arith.constant 0 : index
    %10 = vector.load %arg2[%c128, %c0_8] : memref<624x128xf32, #tpu.memory_space<vmem>>, vector<64x16xf32>
    %cst_9 = arith.constant dense<0.000000e+00> : vector<8x16xf32>
    %11 = tpu.matmul %9, %10, %cst_9 {dimension_numbers = #tpu.dot_dimension_numbers<[1], [0], [0], [1], [0, 0, 1, 1], [], []>} : vector<8x64xf32>, vector<64x16xf32>, vector<8x16xf32> -> vector<8x16xf32>
    %c584 = arith.constant 584 : index
    %c0_10 = arith.constant 0 : index
    %12 = vector.load %arg2[%c584, %c0_10] : memref<624x128xf32, #tpu.memory_space<vmem>>, vector<8x16xf32>
    %13 = arith.addf %11, %12 : vector<8x16xf32>
    %c0_i32 = arith.constant 0 : i32
    %c1_i32 = arith.constant 1 : i32
    %14 = arith.addi %c1_i32, %c0_i32 : i32
    %15 = arith.index_cast %14 : i32 to index
    %c0_11 = arith.constant 0 : index
    %c0_12 = arith.constant 0 : index
    %16 = vector.load %arg1[%15, %c0_11, %c0_12] : memref<9x8x128xf32, #tpu.memory_space<vmem>>, vector<1x8x128xf32>
    %17 = vector.shape_cast %16 : vector<1x8x128xf32> to vector<8x128xf32>
    %c192 = arith.constant 192 : index
    %c0_13 = arith.constant 0 : index
    %18 = vector.load %arg2[%c192, %c0_13] : memref<624x128xf32, #tpu.memory_space<vmem>>, vector<16x64xf32>
    %cst_14 = arith.constant dense<0.000000e+00> : vector<8x64xf32>
    %19 = tpu.matmul %13, %18, %cst_14 {dimension_numbers = #tpu.dot_dimension_numbers<[1], [0], [0], [1], [0, 0, 1, 1], [], []>} : vector<8x16xf32>, vector<16x64xf32>, vector<8x64xf32> -> vector<8x64xf32>
    %20 = arith.addf %19, %0 : vector<8x64xf32>
    %21 = math.tanh %20 : vector<8x64xf32>
    %c208 = arith.constant 208 : index
    %c0_15 = arith.constant 0 : index
    %22 = vector.load %arg2[%c208, %c0_15] : memref<624x128xf32, #tpu.memory_space<vmem>>, vector<64x128xf32>
    %cst_16 = arith.constant dense<0.000000e+00> : vector<8x128xf32>
    %23 = tpu.matmul %21, %22, %cst_16 {dimension_numbers = #tpu.dot_dimension_numbers<[1], [0], [0], [1], [0, 0, 1, 1], [], []>} : vector<8x64xf32>, vector<64x128xf32>, vector<8x128xf32> -> vector<8x128xf32>
    %24 = arith.addf %23, %1 : vector<8x128xf32>
    %25 = arith.mulf %24, %17 : vector<8x128xf32>
    %c272 = arith.constant 272 : index
    %c0_17 = arith.constant 0 : index
    %26 = vector.load %arg2[%c272, %c0_17] : memref<624x128xf32, #tpu.memory_space<vmem>>, vector<128x128xf32>
    %cst_18 = arith.constant dense<0.000000e+00> : vector<8x128xf32>
    %27 = tpu.matmul %25, %26, %cst_18 {dimension_numbers = #tpu.dot_dimension_numbers<[1], [0], [0], [1], [0, 0, 1, 1], [], []>} : vector<8x128xf32>, vector<128x128xf32>, vector<8x128xf32> -> vector<8x128xf32>
    %28 = arith.mulf %24, %27 : vector<8x128xf32>
    %c400 = arith.constant 400 : index
    %c0_19 = arith.constant 0 : index
    %29 = vector.load %arg2[%c400, %c0_19] : memref<624x128xf32, #tpu.memory_space<vmem>>, vector<128x16xf32>
    %cst_20 = arith.constant dense<0.000000e+00> : vector<8x16xf32>
    %30 = tpu.matmul %28, %29, %cst_20 {dimension_numbers = #tpu.dot_dimension_numbers<[1], [0], [0], [1], [0, 0, 1, 1], [], []>} : vector<8x128xf32>, vector<128x16xf32>, vector<8x16xf32> -> vector<8x16xf32>
    %31 = vector.extract_strided_slice %27 {offsets = [0, 0], sizes = [8, 16], strides = [1, 1]} : vector<8x128xf32> to vector<8x16xf32>
    %32 = arith.addf %30, %31 : vector<8x16xf32>
    %cst_21 = arith.constant 1.000000e+00 : f32
    %33 = vector.broadcast %cst_21 : f32 to vector<8x16xf32>
    %34 = arith.mulf %33, %32 : vector<8x16xf32>
    %35 = arith.addf %13, %34 : vector<8x16xf32>
    %c1_i32_22 = arith.constant 1 : i32
    %c1_i32_23 = arith.constant 1 : i32
    %36 = arith.addi %c1_i32_23, %c1_i32_22 : i32
    %37 = arith.index_cast %36 : i32 to index
    %c0_24 = arith.constant 0 : index
    %c0_25 = arith.constant 0 : index
    %38 = vector.load %arg1[%37, %c0_24, %c0_25] : memref<9x8x128xf32, #tpu.memory_space<vmem>>, vector<1x8x128xf32>
    %39 = vector.shape_cast %38 : vector<1x8x128xf32> to vector<8x128xf32>
    %c192_26 = arith.constant 192 : index
    %c0_27 = arith.constant 0 : index
    %40 = vector.load %arg2[%c192_26, %c0_27] : memref<624x128xf32, #tpu.memory_space<vmem>>, vector<16x64xf32>
    %cst_28 = arith.constant dense<0.000000e+00> : vector<8x64xf32>
    %41 = tpu.matmul %35, %40, %cst_28 {dimension_numbers = #tpu.dot_dimension_numbers<[1], [0], [0], [1], [0, 0, 1, 1], [], []>} : vector<8x16xf32>, vector<16x64xf32>, vector<8x64xf32> -> vector<8x64xf32>
    %42 = arith.addf %41, %0 : vector<8x64xf32>
    %43 = math.tanh %42 : vector<8x64xf32>
    %c208_29 = arith.constant 208 : index
    %c0_30 = arith.constant 0 : index
    %44 = vector.load %arg2[%c208_29, %c0_30] : memref<624x128xf32, #tpu.memory_space<vmem>>, vector<64x128xf32>
    %cst_31 = arith.constant dense<0.000000e+00> : vector<8x128xf32>
    %45 = tpu.matmul %43, %44, %cst_31 {dimension_numbers = #tpu.dot_dimension_numbers<[1], [0], [0], [1], [0, 0, 1, 1], [], []>} : vector<8x64xf32>, vector<64x128xf32>, vector<8x128xf32> -> vector<8x128xf32>
    %46 = arith.addf %45, %1 : vector<8x128xf32>
    %47 = arith.mulf %46, %39 : vector<8x128xf32>
    %c272_32 = arith.constant 272 : index
    %c0_33 = arith.constant 0 : index
    %48 = vector.load %arg2[%c272_32, %c0_33] : memref<624x128xf32, #tpu.memory_space<vmem>>, vector<128x128xf32>
    %cst_34 = arith.constant dense<0.000000e+00> : vector<8x128xf32>
    %49 = tpu.matmul %47, %48, %cst_34 {dimension_numbers = #tpu.dot_dimension_numbers<[1], [0], [0], [1], [0, 0, 1, 1], [], []>} : vector<8x128xf32>, vector<128x128xf32>, vector<8x128xf32> -> vector<8x128xf32>
    %50 = arith.mulf %46, %49 : vector<8x128xf32>
    %c400_35 = arith.constant 400 : index
    %c0_36 = arith.constant 0 : index
    %51 = vector.load %arg2[%c400_35, %c0_36] : memref<624x128xf32, #tpu.memory_space<vmem>>, vector<128x16xf32>
    %cst_37 = arith.constant dense<0.000000e+00> : vector<8x16xf32>
    %52 = tpu.matmul %50, %51, %cst_37 {dimension_numbers = #tpu.dot_dimension_numbers<[1], [0], [0], [1], [0, 0, 1, 1], [], []>} : vector<8x128xf32>, vector<128x16xf32>, vector<8x16xf32> -> vector<8x16xf32>
    %53 = vector.extract_strided_slice %49 {offsets = [0, 0], sizes = [8, 16], strides = [1, 1]} : vector<8x128xf32> to vector<8x16xf32>
    %54 = arith.addf %52, %53 : vector<8x16xf32>
    %cst_38 = arith.constant 1.000000e+00 : f32
    %55 = vector.broadcast %cst_38 : f32 to vector<8x16xf32>
    %56 = arith.mulf %55, %54 : vector<8x16xf32>
    %57 = arith.addf %35, %56 : vector<8x16xf32>
    %c2_i32 = arith.constant 2 : i32
    %c1_i32_39 = arith.constant 1 : i32
    %58 = arith.addi %c1_i32_39, %c2_i32 : i32
    %59 = arith.index_cast %58 : i32 to index
    %c0_40 = arith.constant 0 : index
    %c0_41 = arith.constant 0 : index
    %60 = vector.load %arg1[%59, %c0_40, %c0_41] : memref<9x8x128xf32, #tpu.memory_space<vmem>>, vector<1x8x128xf32>
    %61 = vector.shape_cast %60 : vector<1x8x128xf32> to vector<8x128xf32>
    %c192_42 = arith.constant 192 : index
    %c0_43 = arith.constant 0 : index
    %62 = vector.load %arg2[%c192_42, %c0_43] : memref<624x128xf32, #tpu.memory_space<vmem>>, vector<16x64xf32>
    %cst_44 = arith.constant dense<0.000000e+00> : vector<8x64xf32>
    %63 = tpu.matmul %57, %62, %cst_44 {dimension_numbers = #tpu.dot_dimension_numbers<[1], [0], [0], [1], [0, 0, 1, 1], [], []>} : vector<8x16xf32>, vector<16x64xf32>, vector<8x64xf32> -> vector<8x64xf32>
    %64 = arith.addf %63, %0 : vector<8x64xf32>
    %65 = math.tanh %64 : vector<8x64xf32>
    %c208_45 = arith.constant 208 : index
    %c0_46 = arith.constant 0 : index
    %66 = vector.load %arg2[%c208_45, %c0_46] : memref<624x128xf32, #tpu.memory_space<vmem>>, vector<64x128xf32>
    %cst_47 = arith.constant dense<0.000000e+00> : vector<8x128xf32>
    %67 = tpu.matmul %65, %66, %cst_47 {dimension_numbers = #tpu.dot_dimension_numbers<[1], [0], [0], [1], [0, 0, 1, 1], [], []>} : vector<8x64xf32>, vector<64x128xf32>, vector<8x128xf32> -> vector<8x128xf32>
    %68 = arith.addf %67, %1 : vector<8x128xf32>
    %69 = arith.mulf %68, %61 : vector<8x128xf32>
    %c272_48 = arith.constant 272 : index
    %c0_49 = arith.constant 0 : index
    %70 = vector.load %arg2[%c272_48, %c0_49] : memref<624x128xf32, #tpu.memory_space<vmem>>, vector<128x128xf32>
    %cst_50 = arith.constant dense<0.000000e+00> : vector<8x128xf32>
    %71 = tpu.matmul %69, %70, %cst_50 {dimension_numbers = #tpu.dot_dimension_numbers<[1], [0], [0], [1], [0, 0, 1, 1], [], []>} : vector<8x128xf32>, vector<128x128xf32>, vector<8x128xf32> -> vector<8x128xf32>
    %72 = arith.mulf %68, %71 : vector<8x128xf32>
    %c400_51 = arith.constant 400 : index
    %c0_52 = arith.constant 0 : index
    %73 = vector.load %arg2[%c400_51, %c0_52] : memref<624x128xf32, #tpu.memory_space<vmem>>, vector<128x16xf32>
    %cst_53 = arith.constant dense<0.000000e+00> : vector<8x16xf32>
    %74 = tpu.matmul %72, %73, %cst_53 {dimension_numbers = #tpu.dot_dimension_numbers<[1], [0], [0], [1], [0, 0, 1, 1], [], []>} : vector<8x128xf32>, vector<128x16xf32>, vector<8x16xf32> -> vector<8x16xf32>
    %75 = vector.extract_strided_slice %71 {offsets = [0, 0], sizes = [8, 16], strides = [1, 1]} : vector<8x128xf32> to vector<8x16xf32>
    %76 = arith.addf %74, %75 : vector<8x16xf32>
    %cst_54 = arith.constant 1.000000e+00 : f32
    %77 = vector.broadcast %cst_54 : f32 to vector<8x16xf32>
    %78 = arith.mulf %77, %76 : vector<8x16xf32>
    %79 = arith.addf %57, %78 : vector<8x16xf32>
    %c3_i32 = arith.constant 3 : i32
    %c1_i32_55 = arith.constant 1 : i32
    %80 = arith.addi %c1_i32_55, %c3_i32 : i32
    %81 = arith.index_cast %80 : i32 to index
    %c0_56 = arith.constant 0 : index
    %c0_57 = arith.constant 0 : index
    %82 = vector.load %arg1[%81, %c0_56, %c0_57] : memref<9x8x128xf32, #tpu.memory_space<vmem>>, vector<1x8x128xf32>
    %83 = vector.shape_cast %82 : vector<1x8x128xf32> to vector<8x128xf32>
    %c192_58 = arith.constant 192 : index
    %c0_59 = arith.constant 0 : index
    %84 = vector.load %arg2[%c192_58, %c0_59] : memref<624x128xf32, #tpu.memory_space<vmem>>, vector<16x64xf32>
    %cst_60 = arith.constant dense<0.000000e+00> : vector<8x64xf32>
    %85 = tpu.matmul %79, %84, %cst_60 {dimension_numbers = #tpu.dot_dimension_numbers<[1], [0], [0], [1], [0, 0, 1, 1], [], []>} : vector<8x16xf32>, vector<16x64xf32>, vector<8x64xf32> -> vector<8x64xf32>
    %86 = arith.addf %85, %0 : vector<8x64xf32>
    %87 = math.tanh %86 : vector<8x64xf32>
    %c208_61 = arith.constant 208 : index
    %c0_62 = arith.constant 0 : index
    %88 = vector.load %arg2[%c208_61, %c0_62] : memref<624x128xf32, #tpu.memory_space<vmem>>, vector<64x128xf32>
    %cst_63 = arith.constant dense<0.000000e+00> : vector<8x128xf32>
    %89 = tpu.matmul %87, %88, %cst_63 {dimension_numbers = #tpu.dot_dimension_numbers<[1], [0], [0], [1], [0, 0, 1, 1], [], []>} : vector<8x64xf32>, vector<64x128xf32>, vector<8x128xf32> -> vector<8x128xf32>
    %90 = arith.addf %89, %1 : vector<8x128xf32>
    %91 = arith.mulf %90, %83 : vector<8x128xf32>
    %c272_64 = arith.constant 272 : index
    %c0_65 = arith.constant 0 : index
    %92 = vector.load %arg2[%c272_64, %c0_65] : memref<624x128xf32, #tpu.memory_space<vmem>>, vector<128x128xf32>
    %cst_66 = arith.constant dense<0.000000e+00> : vector<8x128xf32>
    %93 = tpu.matmul %91, %92, %cst_66 {dimension_numbers = #tpu.dot_dimension_numbers<[1], [0], [0], [1], [0, 0, 1, 1], [], []>} : vector<8x128xf32>, vector<128x128xf32>, vector<8x128xf32> -> vector<8x128xf32>
    %94 = arith.mulf %90, %93 : vector<8x128xf32>
    %c400_67 = arith.constant 400 : index
    %c0_68 = arith.constant 0 : index
    %95 = vector.load %arg2[%c400_67, %c0_68] : memref<624x128xf32, #tpu.memory_space<vmem>>, vector<128x16xf32>
    %cst_69 = arith.constant dense<0.000000e+00> : vector<8x16xf32>
    %96 = tpu.matmul %94, %95, %cst_69 {dimension_numbers = #tpu.dot_dimension_numbers<[1], [0], [0], [1], [0, 0, 1, 1], [], []>} : vector<8x128xf32>, vector<128x16xf32>, vector<8x16xf32> -> vector<8x16xf32>
    %97 = vector.extract_strided_slice %93 {offsets = [0, 0], sizes = [8, 16], strides = [1, 1]} : vector<8x128xf32> to vector<8x16xf32>
    %98 = arith.addf %96, %97 : vector<8x16xf32>
    %cst_70 = arith.constant 1.000000e+00 : f32
    %99 = vector.broadcast %cst_70 : f32 to vector<8x16xf32>
    %100 = arith.mulf %99, %98 : vector<8x16xf32>
    %101 = arith.addf %79, %100 : vector<8x16xf32>
    %c4_i32 = arith.constant 4 : i32
    %c1_i32_71 = arith.constant 1 : i32
    %102 = arith.addi %c1_i32_71, %c4_i32 : i32
    %103 = arith.index_cast %102 : i32 to index
    %c0_72 = arith.constant 0 : index
    %c0_73 = arith.constant 0 : index
    %104 = vector.load %arg1[%103, %c0_72, %c0_73] : memref<9x8x128xf32, #tpu.memory_space<vmem>>, vector<1x8x128xf32>
    %105 = vector.shape_cast %104 : vector<1x8x128xf32> to vector<8x128xf32>
    %c192_74 = arith.constant 192 : index
    %c0_75 = arith.constant 0 : index
    %106 = vector.load %arg2[%c192_74, %c0_75] : memref<624x128xf32, #tpu.memory_space<vmem>>, vector<16x64xf32>
    %cst_76 = arith.constant dense<0.000000e+00> : vector<8x64xf32>
    %107 = tpu.matmul %101, %106, %cst_76 {dimension_numbers = #tpu.dot_dimension_numbers<[1], [0], [0], [1], [0, 0, 1, 1], [], []>} : vector<8x16xf32>, vector<16x64xf32>, vector<8x64xf32> -> vector<8x64xf32>
    %108 = arith.addf %107, %0 : vector<8x64xf32>
    %109 = math.tanh %108 : vector<8x64xf32>
    %c208_77 = arith.constant 208 : index
    %c0_78 = arith.constant 0 : index
    %110 = vector.load %arg2[%c208_77, %c0_78] : memref<624x128xf32, #tpu.memory_space<vmem>>, vector<64x128xf32>
    %cst_79 = arith.constant dense<0.000000e+00> : vector<8x128xf32>
    %111 = tpu.matmul %109, %110, %cst_79 {dimension_numbers = #tpu.dot_dimension_numbers<[1], [0], [0], [1], [0, 0, 1, 1], [], []>} : vector<8x64xf32>, vector<64x128xf32>, vector<8x128xf32> -> vector<8x128xf32>
    %112 = arith.addf %111, %1 : vector<8x128xf32>
    %113 = arith.mulf %112, %105 : vector<8x128xf32>
    %c272_80 = arith.constant 272 : index
    %c0_81 = arith.constant 0 : index
    %114 = vector.load %arg2[%c272_80, %c0_81] : memref<624x128xf32, #tpu.memory_space<vmem>>, vector<128x128xf32>
    %cst_82 = arith.constant dense<0.000000e+00> : vector<8x128xf32>
    %115 = tpu.matmul %113, %114, %cst_82 {dimension_numbers = #tpu.dot_dimension_numbers<[1], [0], [0], [1], [0, 0, 1, 1], [], []>} : vector<8x128xf32>, vector<128x128xf32>, vector<8x128xf32> -> vector<8x128xf32>
    %116 = arith.mulf %112, %115 : vector<8x128xf32>
    %c400_83 = arith.constant 400 : index
    %c0_84 = arith.constant 0 : index
    %117 = vector.load %arg2[%c400_83, %c0_84] : memref<624x128xf32, #tpu.memory_space<vmem>>, vector<128x16xf32>
    %cst_85 = arith.constant dense<0.000000e+00> : vector<8x16xf32>
    %118 = tpu.matmul %116, %117, %cst_85 {dimension_numbers = #tpu.dot_dimension_numbers<[1], [0], [0], [1], [0, 0, 1, 1], [], []>} : vector<8x128xf32>, vector<128x16xf32>, vector<8x16xf32> -> vector<8x16xf32>
    %119 = vector.extract_strided_slice %115 {offsets = [0, 0], sizes = [8, 16], strides = [1, 1]} : vector<8x128xf32> to vector<8x16xf32>
    %120 = arith.addf %118, %119 : vector<8x16xf32>
    %cst_86 = arith.constant 1.000000e+00 : f32
    %121 = vector.broadcast %cst_86 : f32 to vector<8x16xf32>
    %122 = arith.mulf %121, %120 : vector<8x16xf32>
    %123 = arith.addf %101, %122 : vector<8x16xf32>
    %c5_i32 = arith.constant 5 : i32
    %c1_i32_87 = arith.constant 1 : i32
    %124 = arith.addi %c1_i32_87, %c5_i32 : i32
    %125 = arith.index_cast %124 : i32 to index
    %c0_88 = arith.constant 0 : index
    %c0_89 = arith.constant 0 : index
    %126 = vector.load %arg1[%125, %c0_88, %c0_89] : memref<9x8x128xf32, #tpu.memory_space<vmem>>, vector<1x8x128xf32>
    %127 = vector.shape_cast %126 : vector<1x8x128xf32> to vector<8x128xf32>
    %c192_90 = arith.constant 192 : index
    %c0_91 = arith.constant 0 : index
    %128 = vector.load %arg2[%c192_90, %c0_91] : memref<624x128xf32, #tpu.memory_space<vmem>>, vector<16x64xf32>
    %cst_92 = arith.constant dense<0.000000e+00> : vector<8x64xf32>
    %129 = tpu.matmul %123, %128, %cst_92 {dimension_numbers = #tpu.dot_dimension_numbers<[1], [0], [0], [1], [0, 0, 1, 1], [], []>} : vector<8x16xf32>, vector<16x64xf32>, vector<8x64xf32> -> vector<8x64xf32>
    %130 = arith.addf %129, %0 : vector<8x64xf32>
    %131 = math.tanh %130 : vector<8x64xf32>
    %c208_93 = arith.constant 208 : index
    %c0_94 = arith.constant 0 : index
    %132 = vector.load %arg2[%c208_93, %c0_94] : memref<624x128xf32, #tpu.memory_space<vmem>>, vector<64x128xf32>
    %cst_95 = arith.constant dense<0.000000e+00> : vector<8x128xf32>
    %133 = tpu.matmul %131, %132, %cst_95 {dimension_numbers = #tpu.dot_dimension_numbers<[1], [0], [0], [1], [0, 0, 1, 1], [], []>} : vector<8x64xf32>, vector<64x128xf32>, vector<8x128xf32> -> vector<8x128xf32>
    %134 = arith.addf %133, %1 : vector<8x128xf32>
    %135 = arith.mulf %134, %127 : vector<8x128xf32>
    %c272_96 = arith.constant 272 : index
    %c0_97 = arith.constant 0 : index
    %136 = vector.load %arg2[%c272_96, %c0_97] : memref<624x128xf32, #tpu.memory_space<vmem>>, vector<128x128xf32>
    %cst_98 = arith.constant dense<0.000000e+00> : vector<8x128xf32>
    %137 = tpu.matmul %135, %136, %cst_98 {dimension_numbers = #tpu.dot_dimension_numbers<[1], [0], [0], [1], [0, 0, 1, 1], [], []>} : vector<8x128xf32>, vector<128x128xf32>, vector<8x128xf32> -> vector<8x128xf32>
    %138 = arith.mulf %134, %137 : vector<8x128xf32>
    %c400_99 = arith.constant 400 : index
    %c0_100 = arith.constant 0 : index
    %139 = vector.load %arg2[%c400_99, %c0_100] : memref<624x128xf32, #tpu.memory_space<vmem>>, vector<128x16xf32>
    %cst_101 = arith.constant dense<0.000000e+00> : vector<8x16xf32>
    %140 = tpu.matmul %138, %139, %cst_101 {dimension_numbers = #tpu.dot_dimension_numbers<[1], [0], [0], [1], [0, 0, 1, 1], [], []>} : vector<8x128xf32>, vector<128x16xf32>, vector<8x16xf32> -> vector<8x16xf32>
    %141 = vector.extract_strided_slice %137 {offsets = [0, 0], sizes = [8, 16], strides = [1, 1]} : vector<8x128xf32> to vector<8x16xf32>
    %142 = arith.addf %140, %141 : vector<8x16xf32>
    %cst_102 = arith.constant 1.000000e+00 : f32
    %143 = vector.broadcast %cst_102 : f32 to vector<8x16xf32>
    %144 = arith.mulf %143, %142 : vector<8x16xf32>
    %145 = arith.addf %123, %144 : vector<8x16xf32>
    %c6_i32 = arith.constant 6 : i32
    %c1_i32_103 = arith.constant 1 : i32
    %146 = arith.addi %c1_i32_103, %c6_i32 : i32
    %147 = arith.index_cast %146 : i32 to index
    %c0_104 = arith.constant 0 : index
    %c0_105 = arith.constant 0 : index
    %148 = vector.load %arg1[%147, %c0_104, %c0_105] : memref<9x8x128xf32, #tpu.memory_space<vmem>>, vector<1x8x128xf32>
    %149 = vector.shape_cast %148 : vector<1x8x128xf32> to vector<8x128xf32>
    %c192_106 = arith.constant 192 : index
    %c0_107 = arith.constant 0 : index
    %150 = vector.load %arg2[%c192_106, %c0_107] : memref<624x128xf32, #tpu.memory_space<vmem>>, vector<16x64xf32>
    %cst_108 = arith.constant dense<0.000000e+00> : vector<8x64xf32>
    %151 = tpu.matmul %145, %150, %cst_108 {dimension_numbers = #tpu.dot_dimension_numbers<[1], [0], [0], [1], [0, 0, 1, 1], [], []>} : vector<8x16xf32>, vector<16x64xf32>, vector<8x64xf32> -> vector<8x64xf32>
    %152 = arith.addf %151, %0 : vector<8x64xf32>
    %153 = math.tanh %152 : vector<8x64xf32>
    %c208_109 = arith.constant 208 : index
    %c0_110 = arith.constant 0 : index
    %154 = vector.load %arg2[%c208_109, %c0_110] : memref<624x128xf32, #tpu.memory_space<vmem>>, vector<64x128xf32>
    %cst_111 = arith.constant dense<0.000000e+00> : vector<8x128xf32>
    %155 = tpu.matmul %153, %154, %cst_111 {dimension_numbers = #tpu.dot_dimension_numbers<[1], [0], [0], [1], [0, 0, 1, 1], [], []>} : vector<8x64xf32>, vector<64x128xf32>, vector<8x128xf32> -> vector<8x128xf32>
    %156 = arith.addf %155, %1 : vector<8x128xf32>
    %157 = arith.mulf %156, %149 : vector<8x128xf32>
    %c272_112 = arith.constant 272 : index
    %c0_113 = arith.constant 0 : index
    %158 = vector.load %arg2[%c272_112, %c0_113] : memref<624x128xf32, #tpu.memory_space<vmem>>, vector<128x128xf32>
    %cst_114 = arith.constant dense<0.000000e+00> : vector<8x128xf32>
    %159 = tpu.matmul %157, %158, %cst_114 {dimension_numbers = #tpu.dot_dimension_numbers<[1], [0], [0], [1], [0, 0, 1, 1], [], []>} : vector<8x128xf32>, vector<128x128xf32>, vector<8x128xf32> -> vector<8x128xf32>
    %160 = arith.mulf %156, %159 : vector<8x128xf32>
    %c400_115 = arith.constant 400 : index
    %c0_116 = arith.constant 0 : index
    %161 = vector.load %arg2[%c400_115, %c0_116] : memref<624x128xf32, #tpu.memory_space<vmem>>, vector<128x16xf32>
    %cst_117 = arith.constant dense<0.000000e+00> : vector<8x16xf32>
    %162 = tpu.matmul %160, %161, %cst_117 {dimension_numbers = #tpu.dot_dimension_numbers<[1], [0], [0], [1], [0, 0, 1, 1], [], []>} : vector<8x128xf32>, vector<128x16xf32>, vector<8x16xf32> -> vector<8x16xf32>
    %163 = vector.extract_strided_slice %159 {offsets = [0, 0], sizes = [8, 16], strides = [1, 1]} : vector<8x128xf32> to vector<8x16xf32>
    %164 = arith.addf %162, %163 : vector<8x16xf32>
    %cst_118 = arith.constant 1.000000e+00 : f32
    %165 = vector.broadcast %cst_118 : f32 to vector<8x16xf32>
    %166 = arith.mulf %165, %164 : vector<8x16xf32>
    %167 = arith.addf %145, %166 : vector<8x16xf32>
    %c7_i32 = arith.constant 7 : i32
    %c1_i32_119 = arith.constant 1 : i32
    %168 = arith.addi %c1_i32_119, %c7_i32 : i32
    %169 = arith.index_cast %168 : i32 to index
    %c0_120 = arith.constant 0 : index
    %c0_121 = arith.constant 0 : index
    %170 = vector.load %arg1[%169, %c0_120, %c0_121] : memref<9x8x128xf32, #tpu.memory_space<vmem>>, vector<1x8x128xf32>
    %171 = vector.shape_cast %170 : vector<1x8x128xf32> to vector<8x128xf32>
    %c192_122 = arith.constant 192 : index
    %c0_123 = arith.constant 0 : index
    %172 = vector.load %arg2[%c192_122, %c0_123] : memref<624x128xf32, #tpu.memory_space<vmem>>, vector<16x64xf32>
    %cst_124 = arith.constant dense<0.000000e+00> : vector<8x64xf32>
    %173 = tpu.matmul %167, %172, %cst_124 {dimension_numbers = #tpu.dot_dimension_numbers<[1], [0], [0], [1], [0, 0, 1, 1], [], []>} : vector<8x16xf32>, vector<16x64xf32>, vector<8x64xf32> -> vector<8x64xf32>
    %174 = arith.addf %173, %0 : vector<8x64xf32>
    %175 = math.tanh %174 : vector<8x64xf32>
    %c208_125 = arith.constant 208 : index
    %c0_126 = arith.constant 0 : index
    %176 = vector.load %arg2[%c208_125, %c0_126] : memref<624x128xf32, #tpu.memory_space<vmem>>, vector<64x128xf32>
    %cst_127 = arith.constant dense<0.000000e+00> : vector<8x128xf32>
    %177 = tpu.matmul %175, %176, %cst_127 {dimension_numbers = #tpu.dot_dimension_numbers<[1], [0], [0], [1], [0, 0, 1, 1], [], []>} : vector<8x64xf32>, vector<64x128xf32>, vector<8x128xf32> -> vector<8x128xf32>
    %178 = arith.addf %177, %1 : vector<8x128xf32>
    %179 = arith.mulf %178, %171 : vector<8x128xf32>
    %c272_128 = arith.constant 272 : index
    %c0_129 = arith.constant 0 : index
    %180 = vector.load %arg2[%c272_128, %c0_129] : memref<624x128xf32, #tpu.memory_space<vmem>>, vector<128x128xf32>
    %cst_130 = arith.constant dense<0.000000e+00> : vector<8x128xf32>
    %181 = tpu.matmul %179, %180, %cst_130 {dimension_numbers = #tpu.dot_dimension_numbers<[1], [0], [0], [1], [0, 0, 1, 1], [], []>} : vector<8x128xf32>, vector<128x128xf32>, vector<8x128xf32> -> vector<8x128xf32>
    %182 = arith.mulf %178, %181 : vector<8x128xf32>
    %c400_131 = arith.constant 400 : index
    %c0_132 = arith.constant 0 : index
    %183 = vector.load %arg2[%c400_131, %c0_132] : memref<624x128xf32, #tpu.memory_space<vmem>>, vector<128x16xf32>
    %cst_133 = arith.constant dense<0.000000e+00> : vector<8x16xf32>
    %184 = tpu.matmul %182, %183, %cst_133 {dimension_numbers = #tpu.dot_dimension_numbers<[1], [0], [0], [1], [0, 0, 1, 1], [], []>} : vector<8x128xf32>, vector<128x16xf32>, vector<8x16xf32> -> vector<8x16xf32>
    %185 = vector.extract_strided_slice %181 {offsets = [0, 0], sizes = [8, 16], strides = [1, 1]} : vector<8x128xf32> to vector<8x16xf32>
    %186 = arith.addf %184, %185 : vector<8x16xf32>
    %cst_134 = arith.constant 1.000000e+00 : f32
    %187 = vector.broadcast %cst_134 : f32 to vector<8x16xf32>
    %188 = arith.mulf %187, %186 : vector<8x16xf32>
    %189 = arith.addf %167, %188 : vector<8x16xf32>
    %c8_i32 = arith.constant 8 : i32
    %c528 = arith.constant 528 : index
    %c0_135 = arith.constant 0 : index
    %190 = vector.load %arg2[%c528, %c0_135] : memref<624x128xf32, #tpu.memory_space<vmem>>, vector<16x32xf32>
    %cst_136 = arith.constant dense<0.000000e+00> : vector<8x32xf32>
    %191 = tpu.matmul %189, %190, %cst_136 {dimension_numbers = #tpu.dot_dimension_numbers<[1], [0], [0], [1], [0, 0, 1, 1], [], []>} : vector<8x16xf32>, vector<16x32xf32>, vector<8x32xf32> -> vector<8x32xf32>
    %c608 = arith.constant 608 : index
    %c0_137 = arith.constant 0 : index
    %192 = vector.load %arg2[%c608, %c0_137] : memref<624x128xf32, #tpu.memory_space<vmem>>, vector<8x32xf32>
    %193 = arith.addf %191, %192 : vector<8x32xf32>
    %cst_138 = arith.constant 0.000000e+00 : f32
    %194 = vector.broadcast %cst_138 : f32 to vector<8x32xf32>
    %195 = arith.maximumf %193, %194 : vector<8x32xf32>
    %c544 = arith.constant 544 : index
    %c0_139 = arith.constant 0 : index
    %196 = vector.load %arg2[%c544, %c0_139] : memref<624x128xf32, #tpu.memory_space<vmem>>, vector<32x4xf32>
    %cst_140 = arith.constant dense<0.000000e+00> : vector<8x4xf32>
    %197 = tpu.matmul %195, %196, %cst_140 {dimension_numbers = #tpu.dot_dimension_numbers<[1], [0], [0], [1], [0, 0, 1, 1], [], []>} : vector<8x32xf32>, vector<32x4xf32>, vector<8x4xf32> -> vector<8x4xf32>
    %c616 = arith.constant 616 : index
    %c0_141 = arith.constant 0 : index
    %198 = vector.load %arg2[%c616, %c0_141] : memref<624x128xf32, #tpu.memory_space<vmem>>, vector<8x4xf32>
    %199 = arith.addf %197, %198 : vector<8x4xf32>
    %c0_142 = arith.constant 0 : index
    %c0_143 = arith.constant 0 : index
    %200 = vector.load %arg3[%c0_142, %c0_143] : memref<8x4xf32, #tpu.memory_space<vmem>>, vector<8x4xf32>
    tpu.vector_store %arg3[%c0_142, %c0_143], %199 {strides = array<i32>} : memref<8x4xf32, #tpu.memory_space<vmem>>, vector<8x4xf32>,
    return
  }
  func.func @transform_0(%arg0: i32) -> (i32, i32, i32) {
    %c0_i32 = arith.constant 0 : i32
    %c0_i32_0 = arith.constant 0 : i32
    %c0_i32_1 = arith.constant 0 : i32
    return %c0_i32, %arg0, %c0_i32_0 : i32, i32, i32
  }
  func.func @transform_1(%arg0: i32) -> (i32, i32) {
    %c0_i32 = arith.constant 0 : i32
    %c0_i32_0 = arith.constant 0 : i32
    %c0_i32_1 = arith.constant 0 : i32
    return %c0_i32, %c0_i32_0 : i32, i32
  }
  func.func @transform_2(%arg0: i32) -> (i32, i32) {
    %c0_i32 = arith.constant 0 : i32
    %c0_i32_0 = arith.constant 0 : i32
    return %arg0, %c0_i32 : i32, i32
  }
}

</mosaic_0001>

<bundles_post_ra>
// kernel: tile.9
= control target key start
LH: loop header
LB: loop body
LE: loop exit
PB: predicated region body
PF: predicated region fallthrough
CT: control target
= control target key end

     0   :  { %vm4_vm0 = vcmask 1047556   ;;  %s869_s14 = smov 56   ;;  %s870_s26 = smov 48   ;;  %vm6_vm1 = vcmask 64512   ;;  %vm79_vm2 = vcmask 523712   ;;  %vm166_vm3 = vcmask 458112   ;;  %s1606_s0 = inlined_call_operand.vmem [shape: f32[8,8,8,8], index: 0, kind: input, shape index: {}]   ;;  %s1607_s1 = inlined_call_operand.vmem [shape: f32[8,8,64], index: 1, kind: output, shape index: {}]  }
   0x1   :  { %v706_v0 = vld [vmem:[%s1606_s0 + $0x47] ss:$8 sm:$0xf]   ;;  %v726_v24 = vld [vmem:[%s1606_s0 + $0x106] ss:$8 sm:$0xf]  }
   0x2   :  { %v707_v1 = vld [vmem:[%s1606_s0 + $0x47] ss:$8 sm:$0xf0]   ;;  %v727_v25 = vld [vmem:[%s1606_s0 + $0x106] ss:$8 sm:$0xf0]  }
   0x3   :  { %v97_v2 = vsel %vm4_vm0, %v707_v1, %v706_v0  ;;  %v701_v3 = vld [vmem:[%s1606_s0 + $0x7] ss:$8 sm:$0xf]   ;;  %v724_v26 = vld [vmem:[%s1606_s0 + $0x6] ss:$8 sm:$0xf]   ;;  %v173_v28 = vsel %vm4_vm0, %v727_v25, %v726_v24 }
   0x4   :  { %v702_v4 = vld [vmem:[%s1606_s0 + $0x7] ss:$8 sm:$0xf0]   ;;  %98 = vrot.lane.b32.xlu1 %v97_v2, %s869_s14  ;;  %v725_v27 = vld [vmem:[%s1606_s0 + $0x6] ss:$8 sm:$0xf0]  }
   0x5   :  { %v76_v5 = vsel %vm4_vm0, %v702_v4, %v701_v3  ;;  %v709_v6 = vld [vmem:[%s1606_s0 + $0x147] ss:$8 sm:$0xf]   ;;  %v163_v29 = vsel %vm4_vm0, %v725_v27, %v724_v26  ;;  %v732_v30 = vld [vmem:[%s1606_s0 + $0x146] ss:$8 sm:$0xf]  }
   0x6   :  { %v710_v7 = vld [vmem:[%s1606_s0 + $0x147] ss:$8 sm:$0xf0]   ;;  %77 = vrot.lane.b32.xlu0 %v76_v5, %s869_s14  ;;  %v733_v31 = vld [vmem:[%s1606_s0 + $0x146] ss:$8 sm:$0xf0]  }
   0x7   :  { %v108_v8 = vsel %vm4_vm0, %v710_v7, %v709_v6  ;;  %v703_v9 = vld [vmem:[%s1606_s0 + $0x107] ss:$8 sm:$0xf]   ;;  %v729_v32 = vld [vmem:[%s1606_s0 + $0x46] ss:$8 sm:$0xf]   ;;  %v195_v34 = vsel %vm4_vm0, %v733_v31, %v732_v30 }
   0x8   :  { %v704_v10 = vld [vmem:[%s1606_s0 + $0x107] ss:$8 sm:$0xf0]   ;;  %109 = vrot.lane.b32.xlu1 %v108_v8, %s869_s14  ;;  %v730_v33 = vld [vmem:[%s1606_s0 + $0x46] ss:$8 sm:$0xf0]  }
   0x9   :  { %v86_v11 = vsel %vm4_vm0, %v704_v10, %v703_v9  ;;  %v715_v12 = vld [vmem:[%s1606_s0 + $0x187] ss:$8 sm:$0xf]   ;;  %v184_v35 = vsel %vm4_vm0, %v730_v33, %v729_v32  ;;  %v738_v36 = vld [vmem:[%s1606_s0 + $0x186] ss:$8 sm:$0xf]  }
   0xa   :  { %v716_v13 = vld [vmem:[%s1606_s0 + $0x187] ss:$8 sm:$0xf0]   ;;  %87 = vrot.lane.b32.xlu0 %v86_v11, %s869_s14  ;;  %v739_v37 = vld [vmem:[%s1606_s0 + $0x186] ss:$8 sm:$0xf0]  }
   0xb   :  { %v712_v14 = vld [vmem:[%s1606_s0 + $0x87] ss:$8 sm:$0xf]   ;;  %v130_v16 = vsel %vm4_vm0, %v716_v13, %v715_v12  ;;  %v735_v38 = vld [vmem:[%s1606_s0 + $0x86] ss:$8 sm:$0xf]   ;;  %v217_v40 = vsel %vm4_vm0, %v739_v37, %v738_v36 }
   0xc   :  { %v713_v15 = vld [vmem:[%s1606_s0 + $0x87] ss:$8 sm:$0xf0]   ;;  %131 = vrot.lane.b32.xlu1 %v130_v16, %s869_s14  ;;  %v736_v39 = vld [vmem:[%s1606_s0 + $0x86] ss:$8 sm:$0xf0]  }
   0xd   :  { %v119_v17 = vsel %vm4_vm0, %v713_v15, %v712_v14  ;;  %v721_v18 = vld [vmem:[%s1606_s0 + $0x1c7] ss:$8 sm:$0xf]   ;;  %v206_v41 = vsel %vm4_vm0, %v736_v39, %v735_v38  ;;  %v744_v42 = vld [vmem:[%s1606_s0 + $0x1c6] ss:$8 sm:$0xf]  }
   0xe   :  { %v722_v19 = vld [vmem:[%s1606_s0 + $0x1c7] ss:$8 sm:$0xf0]   ;;  %120 = vrot.lane.b32.xlu0 %v119_v17, %s869_s14  ;;  %v745_v43 = vld [vmem:[%s1606_s0 + $0x1c6] ss:$8 sm:$0xf0]  }
   0xf   :  { %v718_v20 = vld [vmem:[%s1606_s0 + $0xc7] ss:$8 sm:$0xf]   ;;  %v152_v22 = vsel %vm4_vm0, %v722_v19, %v721_v18  ;;  %v741_v44 = vld [vmem:[%s1606_s0 + $0xc6] ss:$8 sm:$0xf]   ;;  %v239_v46 = vsel %vm4_vm0, %v745_v43, %v744_v42 }
  0x10   :  { %v719_v21 = vld [vmem:[%s1606_s0 + $0xc7] ss:$8 sm:$0xf0]   ;;  %153 = vrot.lane.b32.xlu1 %v152_v22, %s869_s14  ;;  %v742_v45 = vld [vmem:[%s1606_s0 + $0xc6] ss:$8 sm:$0xf0]  }
  0x11   :  { %v141_v23 = vsel %vm4_vm0, %v719_v21, %v718_v20  ;;  %v228_v47 = vsel %vm4_vm0, %v742_v45, %v741_v44  ;;  %v749_v48 = vld [vmem:[%s1606_s0 + $0x105] ss:$8 sm:$0xf]   ;;  %s871_s30 = smov 40   ;;  %s872_s5 = smov 32   ;;  %vm253_vm4 = vcmask 392512  }
  0x12   :  { %142 = vrot.lane.b32.xlu0 %v141_v23, %s869_s14  ;;  %v750_v49 = vld [vmem:[%s1606_s0 + $0x105] ss:$8 sm:$0xf0]   ;;  %v772_v8 = vld [vmem:[%s1606_s0 + $0x104] ss:$8 sm:$0xf]  }
  0x13   :  { %v747_v50 = vld [vmem:[%s1606_s0 + $0x5] ss:$8 sm:$0xf]   ;;  %v260_v52 = vsel %vm4_vm0, %v750_v49, %v749_v48  ;;  %v773_v9 = vld [vmem:[%s1606_s0 + $0x104] ss:$8 sm:$0xf0]  }
  0x14   :  { %174 = vrot.lane.b32.xlu1 %v173_v28, %s870_s26  ;;  %v748_v51 = vld [vmem:[%s1606_s0 + $0x5] ss:$8 sm:$0xf0]   ;;  %v770_v10 = vld [vmem:[%s1606_s0 + $0x4] ss:$8 sm:$0xf]   ;;  %v347_v12 = vsel %vm4_vm0, %v773_v9, %v772_v8 }
  0x15   :  { %v250_v53 = vsel %vm4_vm0, %v748_v51, %v747_v50  ;;  %v755_v54 = vld [vmem:[%s1606_s0 + $0x145] ss:$8 sm:$0xf]   ;;  %v771_v11 = vld [vmem:[%s1606_s0 + $0x4] ss:$8 sm:$0xf0]  }
  0x16   :  { %164 = vrot.lane.b32.xlu0 %v163_v29, %s870_s26  ;;  %v756_v55 = vld [vmem:[%s1606_s0 + $0x145] ss:$8 sm:$0xf0]   ;;  %v337_v13 = vsel %vm4_vm0, %v771_v11, %v770_v10  ;;  %v778_v14 = vld [vmem:[%s1606_s0 + $0x144] ss:$8 sm:$0xf]  }
  0x17   :  { %v752_v56 = vld [vmem:[%s1606_s0 + $0x45] ss:$8 sm:$0xf]   ;;  %v282_v58 = vsel %vm4_vm0, %v756_v55, %v755_v54  ;;  %v779_v15 = vld [vmem:[%s1606_s0 + $0x144] ss:$8 sm:$0xf0]  }
  0x18   :  { %196 = vrot.lane.b32.xlu1 %v195_v34, %s870_s26  ;;  %v753_v57 = vld [vmem:[%s1606_s0 + $0x45] ss:$8 sm:$0xf0]   ;;  %v775_v16 = vld [vmem:[%s1606_s0 + $0x44] ss:$8 sm:$0xf]   ;;  %v369_v18 = vsel %vm4_vm0, %v779_v15, %v778_v14 }
  0x19   :  { %v271_v59 = vsel %vm4_vm0, %v753_v57, %v752_v56  ;;  %v761_v60 = vld [vmem:[%s1606_s0 + $0x185] ss:$8 sm:$0xf]   ;;  %v776_v17 = vld [vmem:[%s1606_s0 + $0x44] ss:$8 sm:$0xf0]  }
  0x1a   :  { %185 = vrot.lane.b32.xlu0 %v184_v35, %s870_s26  ;;  %v762_v61 = vld [vmem:[%s1606_s0 + $0x185] ss:$8 sm:$0xf0]   ;;  %v358_v19 = vsel %vm4_vm0, %v776_v17, %v775_v16  ;;  %v784_v20 = vld [vmem:[%s1606_s0 + $0x184] ss:$8 sm:$0xf]  }
  0x1b   :  { %v758_v62 = vld [vmem:[%s1606_s0 + $0x85] ss:$8 sm:$0xf]   ;;  %v304_v0 = vsel %vm4_vm0, %v762_v61, %v761_v60  ;;  %v785_v21 = vld [vmem:[%s1606_s0 + $0x184] ss:$8 sm:$0xf0]  }
  0x1c   :  { %218 = vrot.lane.b32.xlu1 %v217_v40, %s870_s26  ;;  %v759_v63 = vld [vmem:[%s1606_s0 + $0x85] ss:$8 sm:$0xf0]   ;;  %v781_v22 = vld [vmem:[%s1606_s0 + $0x84] ss:$8 sm:$0xf]   ;;  %v391_v24 = vsel %vm4_vm0, %v785_v21, %v784_v20 }
  0x1d   :  { %v293_v1 = vsel %vm4_vm0, %v759_v63, %v758_v62  ;;  %v767_v2 = vld [vmem:[%s1606_s0 + $0x1c5] ss:$8 sm:$0xf]   ;;  %v782_v23 = vld [vmem:[%s1606_s0 + $0x84] ss:$8 sm:$0xf0]  }
  0x1e   :  { %207 = vrot.lane.b32.xlu0 %v206_v41, %s870_s26  ;;  %v768_v3 = vld [vmem:[%s1606_s0 + $0x1c5] ss:$8 sm:$0xf0]   ;;  %v790_v25 = vld [vmem:[%s1606_s0 + $0x1c4] ss:$8 sm:$0xf]   ;;  %v380_v27 = vsel %vm4_vm0, %v782_v23, %v781_v22 }
  0x1f   :  { %v764_v4 = vld [vmem:[%s1606_s0 + $0xc5] ss:$8 sm:$0xf]   ;;  %v326_v6 = vsel %vm4_vm0, %v768_v3, %v767_v2  ;;  %v791_v26 = vld [vmem:[%s1606_s0 + $0x1c4] ss:$8 sm:$0xf0]  }
  0x20   :  { %240 = vrot.lane.b32.xlu1 %v239_v46, %s870_s26  ;;  %v765_v5 = vld [vmem:[%s1606_s0 + $0xc5] ss:$8 sm:$0xf0]   ;;  %v787_v28 = vld [vmem:[%s1606_s0 + $0xc4] ss:$8 sm:$0xf]   ;;  %v413_v35 = vsel %vm4_vm0, %v791_v26, %v790_v25 }
  0x21   :  { %v315_v7 = vsel %vm4_vm0, %v765_v5, %v764_v4  ;;  %v788_v29 = vld [vmem:[%s1606_s0 + $0xc4] ss:$8 sm:$0xf0]   ;;  %v680_v30 = vld [vmem:[%s1606_s0 + $0x40] ss:$8 sm:$0xf]  }
  0x22   :  { %229 = vrot.lane.b32.xlu0 %v228_v47, %s870_s26  ;;  %v795_v31 = vld [vmem:[%s1606_s0 + $0x103] ss:$8 sm:$0xf]   ;;  %v681_v33 = vld [vmem:[%s1606_s0 + $0x40] ss:$8 sm:$0xf0]   ;;  %v402_v41 = vsel %vm4_vm0, %v788_v29, %v787_v28 }
  0x23   :  { %v796_v32 = vld [vmem:[%s1606_s0 + $0x103] ss:$8 sm:$0xf0]   ;;  %v2_v34 = vld [vmem:[%s1606_s0] ss:$8 sm:$0xf]   ;;  %v13_v38 = vsel %vm4_vm0, %v681_v33, %v680_v30 }
  0x24   :  { %261 = vrot.lane.b32.xlu1 %v260_v52, %s871_s30  ;;  %v793_v36 = vld [vmem:[%s1606_s0 + $0x3] ss:$8 sm:$0xf]   ;;  %v3_v39 = vld [vmem:[%s1606_s0] ss:$8 sm:$0xf0]  }
  0x25   :  { %v794_v37 = vld [vmem:[%s1606_s0 + $0x3] ss:$8 sm:$0xf0]   ;;  %v692_v40 = vld [vmem:[%s1606_s0 + $0x140] ss:$8 sm:$0xf]   ;;  %v5_v42 = vsel %vm4_vm0, %v3_v39, %v2_v34 }
  0x26   :  { %251 = vrot.lane.b32.xlu0 %v250_v53, %s871_s30  ;;  %682 = vst.msk [vmem:[%s1607_s1 + $0x8] sm:$0xff] %vm6_vm1, %v13_v38   ;;  %v693_v43 = vld [vmem:[%s1606_s0 + $0x140] ss:$8 sm:$0xf0]   ;;  %7 = vst.msk [vmem:[%s1607_s1] sm:$0xff] %vm6_vm1, %v5_v42   ;;  %v434_v53 = vsel %vm4_vm0, %v796_v32, %v795_v31  ;;  %s873_s25 = smov 24  }
  0x27   :  { %v689_v44 = vld [vmem:[%s1606_s0 + $0x100] ss:$8 sm:$0xf]   ;;  %v49_v45 = vsel %vm4_vm0, %v693_v43, %v692_v40  ;;  %v801_v48 = vld [vmem:[%s1606_s0 + $0x143] ss:$8 sm:$0xf]  }
  0x28   :  { %283 = vrot.lane.b32.xlu1 %v282_v58, %s871_s30  ;;  %v690_v46 = vld [vmem:[%s1606_s0 + $0x100] ss:$8 sm:$0xf0]   ;;  %v802_v49 = vld [vmem:[%s1606_s0 + $0x143] ss:$8 sm:$0xf0]   ;;  %v424_v58 = vsel %vm4_vm0, %v794_v37, %v793_v36 }
  0x29   :  { %v695_v47 = vld [vmem:[%s1606_s0 + $0x180] ss:$8 sm:$0xf]   ;;  %694 = vst.msk [vmem:[%s1607_s1 + $0x28] sm:$0xff] %vm6_vm1, %v49_v45   ;;  %v40_v50 = vsel %vm4_vm0, %v690_v46, %v689_v44  ;;  %v456_v2 = vsel %vm4_vm0, %v802_v49, %v801_v48  ;;  %s874_s4 = smov 16   ;;  %s875_s8 = smov 8  }
  0x2a   :  { %272 = vrot.lane.b32.xlu0 %v271_v59, %s871_s30  ;;  %v696_v51 = vld [vmem:[%s1606_s0 + $0x180] ss:$8 sm:$0xf0]   ;;  %v798_v54 = vld [vmem:[%s1606_s0 + $0x43] ss:$8 sm:$0xf]  }
  0x2b   :  { %v683_v52 = vld [vmem:[%s1606_s0 + $0x80] ss:$8 sm:$0xf]   ;;  %691 = vst.msk [vmem:[%s1607_s1 + $0x20] sm:$0xff] %vm6_vm1, %v40_v50   ;;  %v58_v55 = vsel %vm4_vm0, %v696_v51, %v695_v47  ;;  %vm340_vm5 = vcmask 326912   ;;  %vm427_vm6 = vcmask 261312  }
  0x2c   :  { %305 = vrot.lane.b32.xlu1 %v304_v0, %s871_s30  ;;  %v684_v56 = vld [vmem:[%s1606_s0 + $0x80] ss:$8 sm:$0xf0]   ;;  %697 = vst.msk [vmem:[%s1607_s1 + $0x30] sm:$0xff] %vm6_vm1, %v58_v55   ;;  %vm514_vm7 = vcmask 195712   ;;  %vm601_vm8 = vcmask 130112  }
  0x2d   :  { %v698_v57 = vld [vmem:[%s1606_s0 + $0x1c0] ss:$8 sm:$0xf]   ;;  %v22_v59 = vsel %vm4_vm0, %v684_v56, %v683_v52  ;;  %v799_v62 = vld [vmem:[%s1606_s0 + $0x43] ss:$8 sm:$0xf0]  }
  0x2e   :  { %294 = vrot.lane.b32.xlu0 %v293_v1, %s871_s30  ;;  %v699_v60 = vld [vmem:[%s1606_s0 + $0x1c0] ss:$8 sm:$0xf0]   ;;  %685 = vst.msk [vmem:[%s1607_s1 + $0x10] sm:$0xff] %vm6_vm1, %v22_v59   ;;  %v445_v3 = vsel %vm4_vm0, %v799_v62, %v798_v54 }
  0x2f   :  { %v686_v61 = vld [vmem:[%s1606_s0 + $0xc0] ss:$8 sm:$0xf]   ;;  %v67_v63 = vsel %vm4_vm0, %v699_v60, %v698_v57  ;;  %v807_v4 = vld [vmem:[%s1606_s0 + $0x183] ss:$8 sm:$0xf]  }
  0x30   :  { %327 = vrot.lane.b32.xlu1 %v326_v6, %s871_s30  ;;  %v687_v0 = vld [vmem:[%s1606_s0 + $0xc0] ss:$8 sm:$0xf0]   ;;  %700 = vst.msk [vmem:[%s1607_s1 + $0x38] sm:$0xff] %vm6_vm1, %v67_v63  }
  0x31   :  { %v31_v1 = vsel %vm4_vm0, %v687_v0, %v686_v61  ;;  %v808_v5 = vld [vmem:[%s1606_s0 + $0x183] ss:$8 sm:$0xf0]   ;;  %v818_v16 = vld [vmem:[%s1606_s0 + $0x102] ss:$8 sm:$0xf]  }
  0x32   :  { %316 = vrot.lane.b32.xlu0 %v315_v7, %s871_s30  ;;  %688 = vst.msk [vmem:[%s1607_s1 + $0x18] sm:$0xff] %vm6_vm1, %v31_v1   ;;  %v804_v6 = vld [vmem:[%s1606_s0 + $0x83] ss:$8 sm:$0xf]   ;;  %v478_v8 = vsel %vm4_vm0, %v808_v5, %v807_v4 }
  0x33   :  { %v805_v7 = vld [vmem:[%s1606_s0 + $0x83] ss:$8 sm:$0xf0]   ;;  %v819_v17 = vld [vmem:[%s1606_s0 + $0x102] ss:$8 sm:$0xf0]  }
  0x34   :  { %348 = vrot.lane.b32.xlu1 %v347_v12, %s872_s5  ;;  %v467_v9 = vsel %vm4_vm0, %v805_v7, %v804_v6  ;;  %v813_v10 = vld [vmem:[%s1606_s0 + $0x1c3] ss:$8 sm:$0xf]   ;;  %v521_v20 = vsel %vm4_vm0, %v819_v17, %v818_v16  ;;  %v824_v22 = vld [vmem:[%s1606_s0 + $0x142] ss:$8 sm:$0xf]  }
  0x35   :  { %v814_v11 = vld [vmem:[%s1606_s0 + $0x1c3] ss:$8 sm:$0xf0]   ;;  %v825_v23 = vld [vmem:[%s1606_s0 + $0x142] ss:$8 sm:$0xf0]  }
  0x36   :  { %338 = vrot.lane.b32.xlu0 %v337_v13, %s872_s5  ;;  %v810_v12 = vld [vmem:[%s1606_s0 + $0xc3] ss:$8 sm:$0xf]   ;;  %v500_v14 = vsel %vm4_vm0, %v814_v11, %v813_v10  ;;  %v822_v25 = vld [vmem:[%s1606_s0 + $0x42] ss:$8 sm:$0xf0]   ;;  %v543_v26 = vsel %vm4_vm0, %v825_v23, %v824_v22 }
  0x37   :  { %v811_v13 = vld [vmem:[%s1606_s0 + $0xc3] ss:$8 sm:$0xf0]   ;;  %v830_v28 = vld [vmem:[%s1606_s0 + $0x182] ss:$8 sm:$0xf]  }
  0x38   :  { %370 = vrot.lane.b32.xlu1 %v369_v18, %s872_s5  ;;  %v489_v15 = vsel %vm4_vm0, %v811_v13, %v810_v12  ;;  %v816_v18 = vld [vmem:[%s1606_s0 + $0x2] ss:$8 sm:$0xf]   ;;  %v841_v40 = vld [vmem:[%s1606_s0 + $0x101] ss:$8 sm:$0xf]  }
  0x39   :  { %v831_v29 = vld [vmem:[%s1606_s0 + $0x182] ss:$8 sm:$0xf0]   ;;  %v839_v42 = vld [vmem:[%s1606_s0 + $0x1] ss:$8 sm:$0xf]  }
  0x3a   :  { %359 = vrot.lane.b32.xlu0 %v358_v19, %s872_s5  ;;  %v817_v19 = vld [vmem:[%s1606_s0 + $0x2] ss:$8 sm:$0xf0]   ;;  %v565_v32 = vsel %vm4_vm0, %v831_v29, %v830_v28  ;;  %v840_v43 = vld [vmem:[%s1606_s0 + $0x1] ss:$8 sm:$0xf0]  }
  0x3b   :  { %v511_v21 = vsel %vm4_vm0, %v817_v19, %v816_v18  ;;  %v827_v30 = vld [vmem:[%s1606_s0 + $0x82] ss:$8 sm:$0xf]   ;;  %v598_v45 = vsel %vm4_vm0, %v840_v43, %v839_v42  ;;  %v847_v46 = vld [vmem:[%s1606_s0 + $0x141] ss:$8 sm:$0xf]  }
  0x3c   :  { %392 = vrot.lane.b32.xlu1 %v391_v24, %s872_s5  ;;  %v821_v24 = vld [vmem:[%s1606_s0 + $0x42] ss:$8 sm:$0xf]   ;;  %v848_v47 = vld [vmem:[%s1606_s0 + $0x141] ss:$8 sm:$0xf0]  }
  0x3d   :  { %v828_v31 = vld [vmem:[%s1606_s0 + $0x82] ss:$8 sm:$0xf0]   ;;  %v844_v48 = vld [vmem:[%s1606_s0 + $0x41] ss:$8 sm:$0xf]   ;;  %v630_v50 = vsel %vm4_vm0, %v848_v47, %v847_v46 }
  0x3e   :  { %381 = vrot.lane.b32.xlu0 %v380_v27, %s872_s5  ;;  %v532_v27 = vsel %vm4_vm0, %v822_v25, %v821_v24  ;;  %v554_v33 = vsel %vm4_vm0, %v828_v31, %v827_v30  ;;  %v836_v34 = vld [vmem:[%s1606_s0 + $0x1c2] ss:$8 sm:$0xf]   ;;  %v845_v49 = vld [vmem:[%s1606_s0 + $0x41] ss:$8 sm:$0xf0]  }
  0x3f   :  { %v833_v36 = vld [vmem:[%s1606_s0 + $0xc2] ss:$8 sm:$0xf]   ;;  %v619_v51 = vsel %vm4_vm0, %v845_v49, %v844_v48  ;;  %v853_v52 = vld [vmem:[%s1606_s0 + $0x181] ss:$8 sm:$0xf]  }
  0x40   :  { %414 = vrot.lane.b32.xlu1 %v413_v35, %s872_s5  ;;  %v837_v35 = vld [vmem:[%s1606_s0 + $0x1c2] ss:$8 sm:$0xf0]   ;;  %v850_v54 = vld [vmem:[%s1606_s0 + $0x81] ss:$8 sm:$0xf]  }
  0x41   :  { %v834_v37 = vld [vmem:[%s1606_s0 + $0xc2] ss:$8 sm:$0xf0]   ;;  %v587_v38 = vsel %vm4_vm0, %v837_v35, %v836_v34  ;;  %v851_v55 = vld [vmem:[%s1606_s0 + $0x81] ss:$8 sm:$0xf0]  }
  0x42   :  { %403 = vrot.lane.b32.xlu0 %v402_v41, %s872_s5  ;;  %v576_v39 = vsel %vm4_vm0, %v834_v37, %v833_v36  ;;  %v842_v41 = vld [vmem:[%s1606_s0 + $0x101] ss:$8 sm:$0xf0]   ;;  %v641_v57 = vsel %vm4_vm0, %v851_v55, %v850_v54 }
  0x43   :  { %v608_v44 = vsel %vm4_vm0, %v842_v41, %v841_v40  ;;  %v860_v59 = vld [vmem:[%s1606_s0 + $0x1c1] ss:$8 sm:$0xf0]  }
  0x44   :  { %435 = vrot.lane.b32.xlu1 %v434_v53, %s873_s25  ;;  %v854_v53 = vld [vmem:[%s1606_s0 + $0x181] ss:$8 sm:$0xf0]  }
  0x45   :  { %v652_v56 = vsel %vm4_vm0, %v854_v53, %v853_v52  ;;  %v856_v60 = vld [vmem:[%s1606_s0 + $0xc1] ss:$8 sm:$0xf]  }
  0x46   :  { %425 = vrot.lane.b32.xlu0 %v424_v58, %s873_s25  ;;  %v859_v58 = vld [vmem:[%s1606_s0 + $0x1c1] ss:$8 sm:$0xf]  }
  0x47   :  { %v857_v61 = vld [vmem:[%s1606_s0 + $0xc1] ss:$8 sm:$0xf0]   ;;  %v674_v62 = vsel %vm4_vm0, %v860_v59, %v859_v58 }
  0x48   :  { %457 = vrot.lane.b32.xlu1 %v456_v2, %s873_s25  ;;  %v663_v63 = vsel %vm4_vm0, %v857_v61, %v856_v60 }
  0x4a   :  { %446 = vrot.lane.b32.xlu0 %v445_v3, %s873_s25 }
  0x4c   :  { %479 = vrot.lane.b32.xlu1 %v478_v8, %s873_s25 }
  0x4e   :  { %468 = vrot.lane.b32.xlu0 %v467_v9, %s873_s25 }
  0x50   :  { %501 = vrot.lane.b32.xlu1 %v500_v14, %s873_s25 }
  0x52   :  { %490 = vrot.lane.b32.xlu0 %v489_v15, %s873_s25 }
  0x54   :  { %522 = vrot.lane.b32.xlu1 %v521_v20, %s874_s4 }
  0x56   :  { %512 = vrot.lane.b32.xlu0 %v511_v21, %s874_s4 }
  0x58   :  { %544 = vrot.lane.b32.xlu1 %v543_v26, %s874_s4 }
  0x5a   :  { %533 = vrot.lane.b32.xlu0 %v532_v27, %s874_s4 }
  0x5c   :  { %566 = vrot.lane.b32.xlu1 %v565_v32, %s874_s4 }
  0x5e   :  { %555 = vrot.lane.b32.xlu0 %v554_v33, %s874_s4 }
  0x60   :  { %588 = vrot.lane.b32.xlu1 %v587_v38, %s874_s4 }
  0x62   :  { %577 = vrot.lane.b32.xlu0 %v576_v39, %s874_s4 }
  0x64   :  { %609 = vrot.lane.b32.xlu1 %v608_v44, %s875_s8 }
  0x66   :  { %599 = vrot.lane.b32.xlu0 %v598_v45, %s875_s8 }
  0x68   :  { %631 = vrot.lane.b32.xlu1 %v630_v50, %s875_s8 }
  0x6a   :  { %620 = vrot.lane.b32.xlu0 %v619_v51, %s875_s8 }
  0x6c   :  { %653 = vrot.lane.b32.xlu1 %v652_v56, %s875_s8 }
  0x6e   :  { %642 = vrot.lane.b32.xlu0 %v641_v57, %s875_s8 }
  0x70   :  { %675 = vrot.lane.b32.xlu1 %v674_v62, %s875_s8 }
  0x72   :  { %664 = vrot.lane.b32.xlu0 %v663_v63, %s875_s8 }
  0x76   :  { %v99_v0 = vpop.permute.xlu1 %98  }
  0x77   :  { %708 = vst.msk [vmem:[%s1607_s1 + $0x8] sm:$0xff] %vm79_vm2, %v99_v0  }
  0x78   :  { %v78_v1 = vpop.permute.xlu0 %77  }
  0x79   :  { %80 = vst.msk [vmem:[%s1607_s1] sm:$0xff] %vm79_vm2, %v78_v1  }
  0x7a   :  { %v110_v2 = vpop.permute.xlu1 %109  }
  0x7b   :  { %711 = vst.msk [vmem:[%s1607_s1 + $0x28] sm:$0xff] %vm79_vm2, %v110_v2  }
  0x7c   :  { %v88_v3 = vpop.permute.xlu0 %87  }
  0x7d   :  { %705 = vst.msk [vmem:[%s1607_s1 + $0x20] sm:$0xff] %vm79_vm2, %v88_v3  }
  0x7e   :  { %v132_v4 = vpop.permute.xlu1 %131  }
  0x7f   :  { %717 = vst.msk [vmem:[%s1607_s1 + $0x30] sm:$0xff] %vm79_vm2, %v132_v4  }
  0x80   :  { %v121_v5 = vpop.permute.xlu0 %120  }
  0x81   :  { %714 = vst.msk [vmem:[%s1607_s1 + $0x10] sm:$0xff] %vm79_vm2, %v121_v5  }
  0x82   :  { %v154_v6 = vpop.permute.xlu1 %153  }
  0x83   :  { %723 = vst.msk [vmem:[%s1607_s1 + $0x38] sm:$0xff] %vm79_vm2, %v154_v6  }
  0x84   :  { %v143_v7 = vpop.permute.xlu0 %142  }
  0x85   :  { %720 = vst.msk [vmem:[%s1607_s1 + $0x18] sm:$0xff] %vm79_vm2, %v143_v7  }
  0x86   :  { %v175_v8 = vpop.permute.xlu1 %174  }
  0x87   :  { %728 = vst.msk [vmem:[%s1607_s1 + $0x20] sm:$0xff] %vm166_vm3, %v175_v8  }
  0x88   :  { %v165_v9 = vpop.permute.xlu0 %164  }
  0x89   :  { %167 = vst.msk [vmem:[%s1607_s1] sm:$0xff] %vm166_vm3, %v165_v9  }
  0x8a   :  { %v197_v10 = vpop.permute.xlu1 %196  }
  0x8b   :  { %734 = vst.msk [vmem:[%s1607_s1 + $0x28] sm:$0xff] %vm166_vm3, %v197_v10  }
  0x8c   :  { %v186_v11 = vpop.permute.xlu0 %185  }
  0x8d   :  { %731 = vst.msk [vmem:[%s1607_s1 + $0x8] sm:$0xff] %vm166_vm3, %v186_v11  }
  0x8e   :  { %v219_v12 = vpop.permute.xlu1 %218  }
  0x8f   :  { %740 = vst.msk [vmem:[%s1607_s1 + $0x30] sm:$0xff] %vm166_vm3, %v219_v12  }
  0x90   :  { %v208_v13 = vpop.permute.xlu0 %207  }
  0x91   :  { %737 = vst.msk [vmem:[%s1607_s1 + $0x10] sm:$0xff] %vm166_vm3, %v208_v13  }
  0x92   :  { %v241_v14 = vpop.permute.xlu1 %240  }
  0x93   :  { %746 = vst.msk [vmem:[%s1607_s1 + $0x38] sm:$0xff] %vm166_vm3, %v241_v14  }
  0x94   :  { %v230_v15 = vpop.permute.xlu0 %229  }
  0x95   :  { %743 = vst.msk [vmem:[%s1607_s1 + $0x18] sm:$0xff] %vm166_vm3, %v230_v15  }
  0x96   :  { %v262_v16 = vpop.permute.xlu1 %261  }
  0x97   :  { %751 = vst.msk [vmem:[%s1607_s1 + $0x20] sm:$0xff] %vm253_vm4, %v262_v16  }
  0x98   :  { %v252_v17 = vpop.permute.xlu0 %251  }
  0x99   :  { %254 = vst.msk [vmem:[%s1607_s1] sm:$0xff] %vm253_vm4, %v252_v17  }
  0x9a   :  { %v284_v18 = vpop.permute.xlu1 %283  }
  0x9b   :  { %757 = vst.msk [vmem:[%s1607_s1 + $0x28] sm:$0xff] %vm253_vm4, %v284_v18  }
  0x9c   :  { %v273_v19 = vpop.permute.xlu0 %272  }
  0x9d   :  { %754 = vst.msk [vmem:[%s1607_s1 + $0x8] sm:$0xff] %vm253_vm4, %v273_v19  }
  0x9e   :  { %v306_v20 = vpop.permute.xlu1 %305  }
  0x9f   :  { %763 = vst.msk [vmem:[%s1607_s1 + $0x30] sm:$0xff] %vm253_vm4, %v306_v20  }
  0xa0   :  { %v295_v21 = vpop.permute.xlu0 %294  }
  0xa1   :  { %760 = vst.msk [vmem:[%s1607_s1 + $0x10] sm:$0xff] %vm253_vm4, %v295_v21  }
  0xa2   :  { %v328_v22 = vpop.permute.xlu1 %327  }
  0xa3   :  { %769 = vst.msk [vmem:[%s1607_s1 + $0x38] sm:$0xff] %vm253_vm4, %v328_v22  }
  0xa4   :  { %v317_v23 = vpop.permute.xlu0 %316  }
  0xa5   :  { %766 = vst.msk [vmem:[%s1607_s1 + $0x18] sm:$0xff] %vm253_vm4, %v317_v23  }
  0xa6   :  { %v349_v24 = vpop.permute.xlu1 %348  }
  0xa7   :  { %774 = vst.msk [vmem:[%s1607_s1 + $0x20] sm:$0xff] %vm340_vm5, %v349_v24  }
  0xa8   :  { %v339_v25 = vpop.permute.xlu0 %338  }
  0xa9   :  { %341 = vst.msk [vmem:[%s1607_s1] sm:$0xff] %vm340_vm5, %v339_v25  }
  0xaa   :  { %v371_v26 = vpop.permute.xlu1 %370  }
  0xab   :  { %780 = vst.msk [vmem:[%s1607_s1 + $0x28] sm:$0xff] %vm340_vm5, %v371_v26  }
  0xac   :  { %v360_v27 = vpop.permute.xlu0 %359  }
  0xad   :  { %777 = vst.msk [vmem:[%s1607_s1 + $0x8] sm:$0xff] %vm340_vm5, %v360_v27  }
  0xae   :  { %v393_v28 = vpop.permute.xlu1 %392  }
  0xaf   :  { %786 = vst.msk [vmem:[%s1607_s1 + $0x30] sm:$0xff] %vm340_vm5, %v393_v28  }
  0xb0   :  { %v382_v29 = vpop.permute.xlu0 %381  }
  0xb1   :  { %783 = vst.msk [vmem:[%s1607_s1 + $0x10] sm:$0xff] %vm340_vm5, %v382_v29  }
  0xb2   :  { %v415_v30 = vpop.permute.xlu1 %414  }
  0xb3   :  { %792 = vst.msk [vmem:[%s1607_s1 + $0x38] sm:$0xff] %vm340_vm5, %v415_v30  }
  0xb4   :  { %v404_v31 = vpop.permute.xlu0 %403  }
  0xb5   :  { %789 = vst.msk [vmem:[%s1607_s1 + $0x18] sm:$0xff] %vm340_vm5, %v404_v31  }
  0xb6   :  { %v436_v32 = vpop.permute.xlu1 %435  }
  0xb7   :  { %797 = vst.msk [vmem:[%s1607_s1 + $0x20] sm:$0xff] %vm427_vm6, %v436_v32  }
  0xb8   :  { %v426_v33 = vpop.permute.xlu0 %425  }
  0xb9   :  { %428 = vst.msk [vmem:[%s1607_s1] sm:$0xff] %vm427_vm6, %v426_v33  }
  0xba   :  { %v458_v34 = vpop.permute.xlu1 %457  }
  0xbb   :  { %803 = vst.msk [vmem:[%s1607_s1 + $0x28] sm:$0xff] %vm427_vm6, %v458_v34  }
  0xbc   :  { %v447_v35 = vpop.permute.xlu0 %446  }
  0xbd   :  { %800 = vst.msk [vmem:[%s1607_s1 + $0x8] sm:$0xff] %vm427_vm6, %v447_v35  }
  0xbe   :  { %v480_v36 = vpop.permute.xlu1 %479  }
  0xbf   :  { %809 = vst.msk [vmem:[%s1607_s1 + $0x30] sm:$0xff] %vm427_vm6, %v480_v36  }
  0xc0   :  { %v469_v37 = vpop.permute.xlu0 %468  }
  0xc1   :  { %806 = vst.msk [vmem:[%s1607_s1 + $0x10] sm:$0xff] %vm427_vm6, %v469_v37  }
  0xc2   :  { %v502_v38 = vpop.permute.xlu1 %501  }
  0xc3   :  { %815 = vst.msk [vmem:[%s1607_s1 + $0x38] sm:$0xff] %vm427_vm6, %v502_v38  }
  0xc4   :  { %v491_v39 = vpop.permute.xlu0 %490  }
  0xc5   :  { %812 = vst.msk [vmem:[%s1607_s1 + $0x18] sm:$0xff] %vm427_vm6, %v491_v39  }
  0xc6   :  { %v523_v40 = vpop.permute.xlu1 %522  }
  0xc7   :  { %820 = vst.msk [vmem:[%s1607_s1 + $0x20] sm:$0xff] %vm514_vm7, %v523_v40  }
  0xc8   :  { %v513_v41 = vpop.permute.xlu0 %512  }
  0xc9   :  { %515 = vst.msk [vmem:[%s1607_s1] sm:$0xff] %vm514_vm7, %v513_v41  }
  0xca   :  { %v545_v42 = vpop.permute.xlu1 %544  }
  0xcb   :  { %826 = vst.msk [vmem:[%s1607_s1 + $0x28] sm:$0xff] %vm514_vm7, %v545_v42  }
  0xcc   :  { %v534_v43 = vpop.permute.xlu0 %533  }
  0xcd   :  { %823 = vst.msk [vmem:[%s1607_s1 + $0x8] sm:$0xff] %vm514_vm7, %v534_v43  }
  0xce   :  { %v567_v44 = vpop.permute.xlu1 %566  }
  0xcf   :  { %832 = vst.msk [vmem:[%s1607_s1 + $0x30] sm:$0xff] %vm514_vm7, %v567_v44  }
  0xd0   :  { %v556_v45 = vpop.permute.xlu0 %555  }
  0xd1   :  { %829 = vst.msk [vmem:[%s1607_s1 + $0x10] sm:$0xff] %vm514_vm7, %v556_v45  }
  0xd2   :  { %v589_v46 = vpop.permute.xlu1 %588  }
  0xd3   :  { %838 = vst.msk [vmem:[%s1607_s1 + $0x38] sm:$0xff] %vm514_vm7, %v589_v46  }
  0xd4   :  { %v578_v47 = vpop.permute.xlu0 %577  }
  0xd5   :  { %835 = vst.msk [vmem:[%s1607_s1 + $0x18] sm:$0xff] %vm514_vm7, %v578_v47  }
  0xd6   :  { %v610_v48 = vpop.permute.xlu1 %609  }
  0xd7   :  { %843 = vst.msk [vmem:[%s1607_s1 + $0x20] sm:$0xff] %vm601_vm8, %v610_v48  }
  0xd8   :  { %v600_v49 = vpop.permute.xlu0 %599  }
  0xd9   :  { %602 = vst.msk [vmem:[%s1607_s1] sm:$0xff] %vm601_vm8, %v600_v49  }
  0xda   :  { %v632_v50 = vpop.permute.xlu1 %631  }
  0xdb   :  { %849 = vst.msk [vmem:[%s1607_s1 + $0x28] sm:$0xff] %vm601_vm8, %v632_v50  }
  0xdc   :  { %v621_v51 = vpop.permute.xlu0 %620  }
  0xdd   :  { %846 = vst.msk [vmem:[%s1607_s1 + $0x8] sm:$0xff] %vm601_vm8, %v621_v51  }
  0xde   :  { %v654_v52 = vpop.permute.xlu1 %653  }
  0xdf   :  { %855 = vst.msk [vmem:[%s1607_s1 + $0x30] sm:$0xff] %vm601_vm8, %v654_v52  }
  0xe0   :  { %v643_v53 = vpop.permute.xlu0 %642  }
  0xe1   :  { %852 = vst.msk [vmem:[%s1607_s1 + $0x10] sm:$0xff] %vm601_vm8, %v643_v53  }
  0xe2   :  { %v676_v54 = vpop.permute.xlu1 %675  }
  0xe3   :  { %861 = vst.msk [vmem:[%s1607_s1 + $0x38] sm:$0xff] %vm601_vm8, %v676_v54  }
  0xe4   :  { %v665_v55 = vpop.permute.xlu0 %664  }
  0xe5   :  { %858 = vst.msk [vmem:[%s1607_s1 + $0x18] sm:$0xff] %vm601_vm8, %v665_v55  }

// kernel: emb_rde_forward.1
= control target key start
LH: loop header
LB: loop body
LE: loop exit
PB: predicated region body
PF: predicated region fallthrough
CT: control target
= control target key end

     0   :  { %v4563_v0 = vmov 0.0|0.0   ;;  %vm4564_vm0 = vmmov 0   ;;  %v4565_v4 = vmov 0.0   ;;  %vm111_vm1 = vcmask 523264   ;;  %s5376_s1 = inlined_call_operand.vmem [shape: f32[624,128], index: 1, kind: input, shape index: {}]   ;;  %s5377_s0 = inlined_call_operand.vmem [shape: f32[9,8,128], index: 0, kind: input, shape index: {}]   ;;  %s5378_s2 = inlined_call_operand.vmem [shape: f32[8,4], index: 2, kind: output, shape index: {}]  }
   0x1   :  { %3995 = vmatprep.subr.bf16.mxu0 %v4563_v0  ;;  %v14_v1 = vld [vmem:[%s5376_s1] sm:$0xff]  ;;  %v15_v2 = vld [vmem:[%s5376_s1 + $0x8] sm:$0xff]  ;;  %v16_v3 = vld [vmem:[%s5376_s1 + $0x10] sm:$0xff]  ;;  %3187 = vmatprep.mubr.msk.f32.mxu0 %vm4564_vm0, %v4565_v4  ;;  %vm189_vm2 = vcmask 130048   ;;  %vm2646_vm3 = vcmask 261120   ;;  %vm2720_vm4 = vcmask 31744  }
   0x2   :  { %v3996_v5 = vpack.c.bf16 %v15_v2, %v14_v1  ;;  %v17_v6 = vld [vmem:[%s5376_s1 + $0x18] sm:$0xff]  ;;  %4019 = vmatprep.subr.bf16.mxu1 %v4563_v0  ;;  %3206 = vmatprep.mubr.msk.f32.mxu1 %vm4564_vm0, %v4565_v4  ;;  %v18_v8 = vld [vmem:[%s5376_s1 + $0x20] sm:$0xff]  ;;  %v19_v9 = vld [vmem:[%s5376_s1 + $0x28] sm:$0xff] }
   0x3   :  { %v3999_v7 = vpack.c.bf16 %v17_v6, %v16_v3  ;;  %v102_v10 = vld [vmem:[%s5376_s1 + $0x80] sm:$0xff]  ;;  %v103_v11 = vld [vmem:[%s5376_s1 + $0x88] sm:$0xff]  ;;  %v104_v12 = vld [vmem:[%s5376_s1 + $0x90] sm:$0xff]  ;;  %v4002_v14 = vpack.c.bf16 %v19_v9, %v18_v8 }
   0x4   :  { %3997 = vmatpush3.bf16.msra.mxu0 %v3996_v5  ;;  %v105_v13 = vld [vmem:[%s5376_s1 + $0x98] sm:$0xff]  ;;  %v4020_v15 = vpack.c.bf16 %v103_v11, %v102_v10  ;;  %v20_v16 = vld [vmem:[%s5376_s1 + $0x30] sm:$0xff]  ;;  %v106_v19 = vld [vmem:[%s5376_s1 + $0xa0] sm:$0xff] }
   0x5   :  { %3998 = vmatprep.subr.bf16.mxu0 %v4563_v0  ;;  %v21_v17 = vld [vmem:[%s5376_s1 + $0x38] sm:$0xff]  ;;  %v4023_v18 = vpack.c.bf16 %v105_v13, %v104_v12  ;;  %v107_v20 = vld [vmem:[%s5376_s1 + $0xa8] sm:$0xff]  ;;  %v22_v22 = vld [vmem:[%s5376_s1 + $0x40] sm:$0xff] }
   0x6   :  { %4021 = vmatpush3.bf16.msra.mxu1 %v4020_v15  ;;  %v4005_v21 = vpack.c.bf16 %v21_v17, %v20_v16  ;;  %v23_v23 = vld [vmem:[%s5376_s1 + $0x48] sm:$0xff]  ;;  %v4026_v24 = vpack.c.bf16 %v107_v20, %v106_v19  ;;  %v24_v26 = vld [vmem:[%s5376_s1 + $0x50] sm:$0xff]  ;;  %v25_v27 = vld [vmem:[%s5376_s1 + $0x58] sm:$0xff] }
   0x7   :  { %4022 = vmatprep.subr.bf16.mxu1 %v4563_v0  ;;  %v4008_v25 = vpack.c.bf16 %v23_v23, %v22_v22  ;;  %v4011_v28 = vpack.c.bf16 %v25_v27, %v24_v26  ;;  %v26_v29 = vld [vmem:[%s5376_s1 + $0x60] sm:$0xff]  ;;  %v27_v30 = vld [vmem:[%s5376_s1 + $0x68] sm:$0xff]  ;;  %v28_v32 = vld [vmem:[%s5376_s1 + $0x70] sm:$0xff] }
   0x8   :  { %4000 = vmatpush3.bf16.msra.mxu0 %v3999_v7  ;;  %v4014_v31 = vpack.c.bf16 %v27_v30, %v26_v29  ;;  %v29_v33 = vld [vmem:[%s5376_s1 + $0x78] sm:$0xff]  ;;  %v13_v35 = vld [vmem:[%s5377_s0] sm:$0xff]  ;;  %v108_v36 = vld [vmem:[%s5376_s1 + $0xb0] sm:$0xff] }
   0x9   :  { %4001 = vmatprep.subr.bf16.mxu0 %v4563_v0  ;;  %v4017_v34 = vpack.c.bf16 %v29_v33, %v28_v32  ;;  %v109_v37 = vld [vmem:[%s5376_s1 + $0xb8] sm:$0xff]  ;;  %v30_v39 = vld [vmem:[%s5376_s1 + $0x240] sm:$0xff]  ;;  %v188_v41 = vld [vmem:[%s5376_s1 + $0xc8] sm:$0xff] }
   0xa   :  { %4024 = vmatpush3.bf16.msra.mxu1 %v4023_v18  ;;  %v4029_v38 = vpack.c.bf16 %v109_v37, %v108_v36  ;;  %v187_v40 = vld [vmem:[%s5376_s1 + $0xc0] sm:$0xff]  ;;  %v264_v47 = vld [vmem:[%s5376_s1 + $0xd0] sm:$0xff]  ;;  %v265_v48 = vld [vmem:[%s5376_s1 + $0xd8] sm:$0xff] }
   0xb   :  { %4025 = vmatprep.subr.bf16.mxu1 %v4563_v0  ;;  %v4685_v45 = vpack.c.bf16 %v188_v41, %v187_v40  ;;  %v110_v49 = vld [vmem:[%s5376_s1 + $0x248] sm:$0xff]  ;;  %v4701_v51 = vpack.c.bf16 %v265_v48, %v264_v47  ;;  %v266_v54 = vld [vmem:[%s5376_s1 + $0xe0] sm:$0xff]  ;;  %v268_v57 = vld [vmem:[%s5376_s1 + $0xf0] sm:$0xff] }
   0xc   :  { %4003 = vmatpush3.bf16.msra.mxu0 %v4002_v14  ;;  %v267_v55 = vld [vmem:[%s5376_s1 + $0xe8] sm:$0xff]  ;;  %v269_v58 = vld [vmem:[%s5376_s1 + $0xf8] sm:$0xff]  ;;  %v270_v60 = vld [vmem:[%s5376_s1 + $0x100] sm:$0xff] }
   0xd   :  { %4004 = vmatprep.subr.bf16.mxu0 %v4563_v0  ;;  %v4717_v56 = vpack.c.bf16 %v267_v55, %v266_v54  ;;  %v4727_v59 = vpack.c.bf16 %v269_v58, %v268_v57  ;;  %v271_v61 = vld [vmem:[%s5376_s1 + $0x108] sm:$0xff]  ;;  %v346_v63 = vld [vmem:[%s5376_s1 + $0x110] sm:$0xff]  ;;  %v347_v1 = vld [vmem:[%s5376_s1 + $0x118] sm:$0xff] }
   0xe   :  { %4027 = vmatpush3.bf16.msra.mxu1 %v4026_v24  ;;  %v4736_v62 = vpack.c.bf16 %v271_v61, %v270_v60  ;;  %v348_v2 = vld [vmem:[%s5376_s1 + $0x120] sm:$0xff]  ;;  %v4750_v3 = vpack.c.bf16 %v347_v1, %v346_v63  ;;  %v349_v5 = vld [vmem:[%s5376_s1 + $0x128] sm:$0xff]  ;;  %v350_v7 = vld [vmem:[%s5376_s1 + $0x130] sm:$0xff] }
   0xf   :  { %4028 = vmatprep.subr.bf16.mxu1 %v4563_v0  ;;  %v4756_v6 = vpack.c.bf16 %v349_v5, %v348_v2  ;;  %v351_v8 = vld [vmem:[%s5376_s1 + $0x138] sm:$0xff]  ;;  %v352_v10 = vld [vmem:[%s5376_s1 + $0x140] sm:$0xff]  ;;  %v353_v11 = vld [vmem:[%s5376_s1 + $0x148] sm:$0xff] }
  0x10   :  { %4006 = vmatpush3.bf16.msra.mxu0 %v4005_v21  ;;  %v4766_v9 = vpack.c.bf16 %v351_v8, %v350_v7  ;;  %v4776_v12 = vpack.c.bf16 %v353_v11, %v352_v10  ;;  %v354_v13 = vld [vmem:[%s5376_s1 + $0x150] sm:$0xff]  ;;  %v355_v14 = vld [vmem:[%s5376_s1 + $0x158] sm:$0xff]  ;;  %v356_v16 = vld [vmem:[%s5376_s1 + $0x160] sm:$0xff] }
  0x11   :  { %4007 = vmatprep.subr.bf16.mxu0 %v4563_v0  ;;  %v4786_v15 = vpack.c.bf16 %v355_v14, %v354_v13  ;;  %v357_v17 = vld [vmem:[%s5376_s1 + $0x168] sm:$0xff]  ;;  %v358_v19 = vld [vmem:[%s5376_s1 + $0x170] sm:$0xff]  ;;  %v359_v20 = vld [vmem:[%s5376_s1 + $0x178] sm:$0xff] }
  0x12   :  { %4030 = vmatpush3.bf16.msra.mxu1 %v4029_v38  ;;  %v4796_v18 = vpack.c.bf16 %v357_v17, %v356_v16  ;;  %v4806_v21 = vpack.c.bf16 %v359_v20, %v358_v19  ;;  %v4814_v22 = vld [vmem:[%s5376_s1 + $0x250] sm:$0xff]  ;;  %v360_v27 = vld [vmem:[%s5376_s1 + $0x180] sm:$0xff]  ;;  %v438_v37 = vld [vmem:[%s5376_s1 + $0x1b8] sm:$0xff] }
  0x13   :  { %4031 = vmatprep.subr.bf16.mxu1 %v4563_v0  ;;  %v433_v30 = vld [vmem:[%s5376_s1 + $0x190] sm:$0xff]  ;;  %v435_v32 = vld [vmem:[%s5376_s1 + $0x1a0] sm:$0xff]  ;;  %v440_v40 = vld [vmem:[%s5376_s1 + $0x1c8] sm:$0xff] }
  0x14   :  { %4009 = vmatpush3.bf16.msra.mxu0 %v4008_v25  ;;  %v437_v36 = vld [vmem:[%s5376_s1 + $0x1b0] sm:$0xff]  ;;  %v444_v47 = vld [vmem:[%s5376_s1 + $0x1e8] sm:$0xff]  ;;  %v4903_v54 = vld [vmem:[%s5376_s1 + $0x258] sm:$0xff] }
  0x15   :  { %4010 = vmatprep.subr.bf16.mxu0 %v4563_v0  ;;  %v4855_v38 = vpack.c.bf16 %v438_v37, %v437_v36  ;;  %v2727_v55 = vld [vmem:[%s5377_s0 + $0x8] sm:$0xff]  ;;  %v447_v63 = vld [vmem:[%s5376_s1 + $0x200] sm:$0xff]  ;;  %v2730_v20 = vld [vmem:[%s5377_s0 + $0x10] sm:$0xff] }
  0x16   :  { %v448_v1 = vld [vmem:[%s5376_s1 + $0x208] sm:$0xff] }
  0x17   :  { %v4919_v2 = vpack.c.bf16 %v448_v1, %v447_v63 }
  0x18   :  { %4012 = vmatpush3.bf16.msra.mxu0 %v4011_v28  ;;  %v361_v28 = vld [vmem:[%s5376_s1 + $0x188] sm:$0xff] }
  0x19   :  { %4013 = vmatprep.subr.bf16.mxu0 %v4563_v0  ;;  %v4826_v29 = vpack.c.bf16 %v361_v28, %v360_v27 }
  0x1c   :  { %4015 = vmatpush3.bf16.msra.mxu0 %v4014_v31  ;;  %v434_v31 = vld [vmem:[%s5376_s1 + $0x198] sm:$0xff] }
  0x1d   :  { %4016 = vmatprep.subr.bf16.mxu0 %v4563_v0  ;;  %v4839_v33 = vpack.c.bf16 %v434_v31, %v433_v30 }
  0x20   :  { %4018 = vmatpush3.bf16.msra.mxu0 %v4017_v34  ;;  %v436_v34 = vld [vmem:[%s5376_s1 + $0x1a8] sm:$0xff] }
  0x21   :  { %4046 = vmatprep.subr.bf16.mxu0 %v4563_v0 }
  0x23   :  { %3188 = vmatmul.mubr.f32.vlgmr.msra.gmra.mrb[0].mxu0 %v13_v35  ;;  %v4845_v35 = vpack.c.bf16 %v436_v34, %v435_v32 }
  0x24   :  { %3267 = vmatprep.mubr.msk.f32.mxu0 %vm4564_vm0, %v4565_v4  ;;  %4048 = vmatpush3.bf16.msra.mxu0 %v4750_v3 }
  0x25   :  { %4049 = vmatprep.subr.bf16.mxu0 %v4563_v0 }
  0x28   :  { %4051 = vmatpush3.bf16.msra.mxu0 %v4756_v6 }
  0x29   :  { %4052 = vmatprep.subr.bf16.mxu0 %v4563_v0 }
  0x2c   :  { %4054 = vmatpush3.bf16.msra.mxu0 %v4766_v9 }
  0x2d   :  { %4055 = vmatprep.subr.bf16.mxu0 %v4563_v0 }
  0x30   :  { %4057 = vmatpush3.bf16.msra.mxu0 %v4776_v12 }
  0x31   :  { %4058 = vmatprep.subr.bf16.mxu0 %v4563_v0 }
  0x34   :  { %4060 = vmatpush3.bf16.msra.mxu0 %v4786_v15 }
  0x35   :  { %4061 = vmatprep.subr.bf16.mxu0 %v4563_v0 }
  0x38   :  { %4063 = vmatpush3.bf16.msra.mxu0 %v4796_v18 }
  0x39   :  { %4064 = vmatprep.subr.bf16.mxu0 %v4563_v0 }
  0x3c   :  { %4066 = vmatpush3.bf16.msra.mxu0 %v4806_v21 }
  0x3d   :  { %4067 = vmatprep.subr.bf16.mxu0 %v4563_v0 }
  0x40   :  { %4069 = vmatpush3.bf16.msra.mxu0 %v4826_v29 }
  0x41   :  { %4094 = vmatprep.subr.bf16.mxu0 %v4563_v0 }
  0xf6   :  { %v97_v42 = vpop.f32.mrb[0].mxu0 }
  0xf7   :  { %v98_v43 = vadd.f32 %v97_v42, %v30_v39  ;;  %v3189_v44 = vpop.f32.mrb[1].mxu0  ;;  %v439_v39 = vld [vmem:[%s5376_s1 + $0x1c0] sm:$0xff]  ;;  %v441_v42 = vld [vmem:[%s5376_s1 + $0x1d0] sm:$0xff] }
  0xf8   :  { %v4865_v41 = vpack.c.bf16 %v440_v40, %v439_v39 }
  0xf9   :  { %v101_v46 = vmax.f32 %v98_v43, 0.0  ;;  %v442_v43 = vld [vmem:[%s5376_s1 + $0x1d8] sm:$0xff] }
  0xfa   :  { %v4875_v44 = vpack.c.bf16 %v442_v43, %v441_v42  ;;  %v2733_v43 = vld [vmem:[%s5377_s0 + $0x18] sm:$0xff] }
  0xfb   :  { %3207 = vmatmul.mubr.msk.f32.vlgmr.msra.gmra.mrb[0].mxu1 %vm111_vm1, %v101_v46  ;;  %v443_v46 = vld [vmem:[%s5376_s1 + $0x1e0] sm:$0xff] }
  0xfc   :  { %4033 = vmatpush3.bf16.msra.mxu1 %v4685_v45  ;;  %3213 = vmatprep.mubr.msk.f32.mxu1 %vm4564_vm0, %v4565_v4  ;;  %v4885_v48 = vpack.c.bf16 %v444_v47, %v443_v46 }
  0xfd   :  { %4034 = vmatprep.subr.bf16.mxu1 %v4563_v0 }
 0x1ce   :  { %v181_v50 = vpop.f32.mrb[0].mxu1 }
 0x1cf   :  { %v4703_v52 = vadd.f32 %v181_v50, %v110_v49  ;;  %v3208_v53 = vpop.f32.mrb[1].mxu1  ;;  %v445_v49 = vld [vmem:[%s5376_s1 + $0x1f0] sm:$0xff]  ;;  %v446_v50 = vld [vmem:[%s5376_s1 + $0x1f8] sm:$0xff] }
 0x1d0   :  { %v4895_v53 = vpack.c.bf16 %v446_v50, %v445_v49 }
 0x1d1   :  { %3214 = vmatmul.mubr.msk.f32.vlgmr.msra.gmra.mrb[2].mxu1 %vm189_vm2, %v4703_v52 }
 0x1d2   :  { %4036 = vmatpush3.bf16.msra.mxu1 %v4701_v51  ;;  %3232 = vmatprep.mubr.msk.f32.mxu1 %vm4564_vm0, %v4565_v4 }
 0x1d3   :  { %4037 = vmatprep.subr.bf16.mxu1 %v4563_v0 }
 0x1d6   :  { %4039 = vmatpush3.bf16.msra.mxu1 %v4717_v56 }
 0x1d7   :  { %4040 = vmatprep.subr.bf16.mxu1 %v4563_v0 }
 0x1da   :  { %4042 = vmatpush3.bf16.msra.mxu1 %v4727_v59 }
 0x1db   :  { %4043 = vmatprep.subr.bf16.mxu1 %v4563_v0 }
 0x1de   :  { %4045 = vmatpush3.bf16.msra.mxu1 %v4736_v62 }
 0x1df   :  { %4070 = vmatprep.subr.bf16.mxu1 %v4563_v0 }
 0x2a4   :  { %v259_v23 = vpop.f32.mrb[2].mxu1 }
 0x2a5   :  { %v260_v24 = vadd.f32 %v259_v23, %v4814_v22  ;;  %v3215_v25 = vpop.f32.mrb[3].mxu1 }
 0x2a7   :  { %4547 = vtanh.f32 %v260_v24 }
 0x2b1   :  { %v4548_v26 = vpop.eup %4547 }
 0x2b2   :  { %3233 = vmatmul.mubr.msk.f32.vlgmr.msra.gmra.mrb[4].mxu1 %vm111_vm1, %v4548_v26 }
 0x2b3   :  { %3302 = vmatprep.mubr.msk.f32.mxu1 %vm4564_vm0, %v4565_v4  ;;  %4072 = vmatpush3.bf16.msra.mxu1 %v4839_v33 }
 0x2b4   :  { %4073 = vmatprep.subr.bf16.mxu1 %v4563_v0 }
 0x2b7   :  { %4075 = vmatpush3.bf16.msra.mxu1 %v4845_v35 }
 0x2b8   :  { %4076 = vmatprep.subr.bf16.mxu1 %v4563_v0 }
 0x2bb   :  { %4078 = vmatpush3.bf16.msra.mxu1 %v4855_v38 }
 0x2bc   :  { %4079 = vmatprep.subr.bf16.mxu1 %v4563_v0 }
 0x2bf   :  { %4081 = vmatpush3.bf16.msra.mxu1 %v4865_v41 }
 0x2c0   :  { %4082 = vmatprep.subr.bf16.mxu1 %v4563_v0 }
 0x2c3   :  { %4084 = vmatpush3.bf16.msra.mxu1 %v4875_v44 }
 0x2c4   :  { %4085 = vmatprep.subr.bf16.mxu1 %v4563_v0 }
 0x2c7   :  { %4087 = vmatpush3.bf16.msra.mxu1 %v4885_v48 }
 0x2c8   :  { %4088 = vmatprep.subr.bf16.mxu1 %v4563_v0 }
 0x2cb   :  { %4090 = vmatpush3.bf16.msra.mxu1 %v4895_v53 }
 0x2cc   :  { %4091 = vmatprep.subr.bf16.mxu1 %v4563_v0 }
 0x2cf   :  { %4093 = vmatpush3.bf16.msra.mxu1 %v4919_v2 }
 0x2d0   :  { %4109 = vmatprep.subr.bf16.mxu1 %v4563_v0 }
 0x385   :  { %v341_v57 = vpop.f32.mrb[4].mxu1 }
 0x386   :  { %v342_v58 = vadd.f32 %v341_v57, %v4903_v54  ;;  %v3234_v60 = vpop.f32.mrb[5].mxu1 }
 0x388   :  { %v345_v61 = vmul.f32 %v2727_v55, %v342_v58 }
 0x38a   :  { %3268 = vmatmul.mubr.f32.vlgmr.msra.gmra.mrb[2].mxu0 %v345_v61 }
 0x38b   :  { %4096 = vmatpush3.bf16.msra.mxu0 %v4685_v45  ;;  %3309 = vmatprep.mubr.msk.f32.mxu0 %vm4564_vm0, %v4565_v4 }
 0x38c   :  { %4097 = vmatprep.subr.bf16.mxu0 %v4563_v0 }
 0x45d   :  { %v428_v5 = vpop.f32.mrb[2].mxu0 }
 0x45e   :  { %v432_v7 = vmul.f32 %v428_v5, %v342_v58  ;;  %v3269_v8 = vpop.f32.mrb[3].mxu0 }
 0x460   :  { %3303 = vmatmul.mubr.f32.vlgmr.msra.gmra.mrb[6].mxu1 %v432_v7 }
 0x461   :  { %4111 = vmatpush3.bf16.msra.mxu1 %v4750_v3  ;;  %3363 = vmatprep.mubr.msk.f32.mxu1 %vm4564_vm0, %v4565_v4 }
 0x462   :  { %4112 = vmatprep.subr.bf16.mxu1 %v4563_v0 }
 0x465   :  { %4114 = vmatpush3.bf16.msra.mxu1 %v4756_v6 }
 0x466   :  { %4115 = vmatprep.subr.bf16.mxu1 %v4563_v0 }
 0x469   :  { %4117 = vmatpush3.bf16.msra.mxu1 %v4766_v9 }
 0x46a   :  { %4118 = vmatprep.subr.bf16.mxu1 %v4563_v0 }
 0x46d   :  { %4120 = vmatpush3.bf16.msra.mxu1 %v4776_v12 }
 0x46e   :  { %4121 = vmatprep.subr.bf16.mxu1 %v4563_v0 }
 0x471   :  { %4123 = vmatpush3.bf16.msra.mxu1 %v4786_v15 }
 0x472   :  { %4124 = vmatprep.subr.bf16.mxu1 %v4563_v0 }
 0x475   :  { %4126 = vmatpush3.bf16.msra.mxu1 %v4796_v18 }
 0x476   :  { %4127 = vmatprep.subr.bf16.mxu1 %v4563_v0 }
 0x479   :  { %4129 = vmatpush3.bf16.msra.mxu1 %v4806_v21 }
 0x47a   :  { %4130 = vmatprep.subr.bf16.mxu1 %v4563_v0 }
 0x47d   :  { %4132 = vmatpush3.bf16.msra.mxu1 %v4826_v29 }
 0x47e   :  { %4157 = vmatprep.subr.bf16.mxu1 %v4563_v0 }
 0x533   :  { %v515_v10 = vpop.f32.mrb[6].mxu1 }
 0x534   :  { %v516_v11 = vadd.f32 %v515_v10, %v428_v5  ;;  %v3304_v13 = vpop.f32.mrb[7].mxu1 }
 0x536   :  { %v4942_v14 = vadd.f32 %v516_v11, %v4703_v52  ;;  %v2736_v11 = vld [vmem:[%s5377_s0 + $0x20] sm:$0xff] }
 0x538   :  { %3310 = vmatmul.mubr.msk.f32.vlgmr.msra.gmra.mrb[4].mxu0 %vm189_vm2, %v4942_v14 }
 0x539   :  { %4099 = vmatpush3.bf16.msra.mxu0 %v4701_v51  ;;  %3328 = vmatprep.mubr.msk.f32.mxu0 %vm4564_vm0, %v4565_v4 }
 0x53a   :  { %4100 = vmatprep.subr.bf16.mxu0 %v4563_v0 }
 0x53d   :  { %4102 = vmatpush3.bf16.msra.mxu0 %v4717_v56 }
 0x53e   :  { %4103 = vmatprep.subr.bf16.mxu0 %v4563_v0 }
 0x541   :  { %4105 = vmatpush3.bf16.msra.mxu0 %v4727_v59 }
 0x542   :  { %4106 = vmatprep.subr.bf16.mxu0 %v4563_v0 }
 0x545   :  { %4108 = vmatpush3.bf16.msra.mxu0 %v4736_v62 }
 0x546   :  { %4133 = vmatprep.subr.bf16.mxu0 %v4563_v0 }
 0x60b   :  { %v591_v52 = vpop.f32.mrb[4].mxu0 }
 0x60c   :  { %v592_v16 = vadd.f32 %v591_v52, %v4814_v22  ;;  %v3311_v17 = vpop.f32.mrb[5].mxu0 }
 0x60e   :  { %4549 = vtanh.f32 %v592_v16 }
 0x618   :  { %v4550_v19 = vpop.eup %4549 }
 0x619   :  { %3329 = vmatmul.mubr.msk.f32.vlgmr.msra.gmra.mrb[6].mxu0 %vm111_vm1, %v4550_v19 }
 0x61a   :  { %4135 = vmatpush3.bf16.msra.mxu0 %v4839_v33  ;;  %3398 = vmatprep.mubr.msk.f32.mxu0 %vm4564_vm0, %v4565_v4 }
 0x61b   :  { %4136 = vmatprep.subr.bf16.mxu0 %v4563_v0 }
 0x61e   :  { %4138 = vmatpush3.bf16.msra.mxu0 %v4845_v35 }
 0x61f   :  { %4139 = vmatprep.subr.bf16.mxu0 %v4563_v0 }
 0x622   :  { %4141 = vmatpush3.bf16.msra.mxu0 %v4855_v38 }
 0x623   :  { %4142 = vmatprep.subr.bf16.mxu0 %v4563_v0 }
 0x626   :  { %4144 = vmatpush3.bf16.msra.mxu0 %v4865_v41 }
 0x627   :  { %4145 = vmatprep.subr.bf16.mxu0 %v4563_v0 }
 0x62a   :  { %4147 = vmatpush3.bf16.msra.mxu0 %v4875_v44 }
 0x62b   :  { %4148 = vmatprep.subr.bf16.mxu0 %v4563_v0 }
 0x62e   :  { %4150 = vmatpush3.bf16.msra.mxu0 %v4885_v48 }
 0x62f   :  { %4151 = vmatprep.subr.bf16.mxu0 %v4563_v0 }
 0x632   :  { %4153 = vmatpush3.bf16.msra.mxu0 %v4895_v53 }
 0x633   :  { %4154 = vmatprep.subr.bf16.mxu0 %v4563_v0 }
 0x636   :  { %4156 = vmatpush3.bf16.msra.mxu0 %v4919_v2 }
 0x637   :  { %4172 = vmatprep.subr.bf16.mxu0 %v4563_v0 }
 0x6ec   :  { %v665_v23 = vpop.f32.mrb[6].mxu0 }
 0x6ed   :  { %v666_v24 = vadd.f32 %v665_v23, %v4903_v54  ;;  %v3330_v25 = vpop.f32.mrb[7].mxu0 }
 0x6ef   :  { %v669_v26 = vmul.f32 %v2730_v20, %v666_v24 }
 0x6f1   :  { %3364 = vmatmul.mubr.f32.vlgmr.msra.gmra.mrb[8].mxu1 %v669_v26 }
 0x6f2   :  { %4159 = vmatpush3.bf16.msra.mxu1 %v4685_v45  ;;  %3405 = vmatprep.mubr.msk.f32.mxu1 %vm4564_vm0, %v4565_v4 }
 0x6f3   :  { %4160 = vmatprep.subr.bf16.mxu1 %v4563_v0 }
 0x7c4   :  { %v736_v27 = vpop.f32.mrb[8].mxu1 }
 0x7c5   :  { %v740_v28 = vmul.f32 %v736_v27, %v666_v24  ;;  %v3365_v30 = vpop.f32.mrb[9].mxu1 }
 0x7c7   :  { %3399 = vmatmul.mubr.f32.vlgmr.msra.gmra.mrb[8].mxu0 %v740_v28 }
 0x7c8   :  { %4174 = vmatpush3.bf16.msra.mxu0 %v4750_v3  ;;  %3459 = vmatprep.mubr.msk.f32.mxu0 %vm4564_vm0, %v4565_v4 }
 0x7c9   :  { %4175 = vmatprep.subr.bf16.mxu0 %v4563_v0 }
 0x7cc   :  { %4177 = vmatpush3.bf16.msra.mxu0 %v4756_v6 }
 0x7cd   :  { %4178 = vmatprep.subr.bf16.mxu0 %v4563_v0 }
 0x7d0   :  { %4180 = vmatpush3.bf16.msra.mxu0 %v4766_v9 }
 0x7d1   :  { %4181 = vmatprep.subr.bf16.mxu0 %v4563_v0 }
 0x7d4   :  { %4183 = vmatpush3.bf16.msra.mxu0 %v4776_v12 }
 0x7d5   :  { %4184 = vmatprep.subr.bf16.mxu0 %v4563_v0 }
 0x7d8   :  { %4186 = vmatpush3.bf16.msra.mxu0 %v4786_v15 }
 0x7d9   :  { %4187 = vmatprep.subr.bf16.mxu0 %v4563_v0 }
 0x7dc   :  { %4189 = vmatpush3.bf16.msra.mxu0 %v4796_v18 }
 0x7dd   :  { %4190 = vmatprep.subr.bf16.mxu0 %v4563_v0 }
 0x7e0   :  { %4192 = vmatpush3.bf16.msra.mxu0 %v4806_v21 }
 0x7e1   :  { %4193 = vmatprep.subr.bf16.mxu0 %v4563_v0 }
 0x7e4   :  { %4195 = vmatpush3.bf16.msra.mxu0 %v4826_v29 }
 0x7e5   :  { %4220 = vmatprep.subr.bf16.mxu0 %v4563_v0 }
 0x89a   :  { %v807_v31 = vpop.f32.mrb[8].mxu0 }
 0x89b   :  { %v808_v32 = vadd.f32 %v807_v31, %v736_v27  ;;  %v3400_v34 = vpop.f32.mrb[9].mxu0 }
 0x89d   :  { %v5003_v36 = vadd.f32 %v808_v32, %v4942_v14  ;;  %v2739_v32 = vld [vmem:[%s5377_s0 + $0x28] sm:$0xff] }
 0x89f   :  { %3406 = vmatmul.mubr.msk.f32.vlgmr.msra.gmra.mrb[10].mxu1 %vm189_vm2, %v5003_v36 }
 0x8a0   :  { %4162 = vmatpush3.bf16.msra.mxu1 %v4701_v51  ;;  %3424 = vmatprep.mubr.msk.f32.mxu1 %vm4564_vm0, %v4565_v4 }
 0x8a1   :  { %4163 = vmatprep.subr.bf16.mxu1 %v4563_v0 }
 0x8a4   :  { %4165 = vmatpush3.bf16.msra.mxu1 %v4717_v56 }
 0x8a5   :  { %4166 = vmatprep.subr.bf16.mxu1 %v4563_v0 }
 0x8a8   :  { %4168 = vmatpush3.bf16.msra.mxu1 %v4727_v59 }
 0x8a9   :  { %4169 = vmatprep.subr.bf16.mxu1 %v4563_v0 }
 0x8ac   :  { %4171 = vmatpush3.bf16.msra.mxu1 %v4736_v62 }
 0x8ad   :  { %4196 = vmatprep.subr.bf16.mxu1 %v4563_v0 }
 0x972   :  { %v883_v37 = vpop.f32.mrb[10].mxu1 }
 0x973   :  { %v884_v39 = vadd.f32 %v883_v37, %v4814_v22  ;;  %v3407_v40 = vpop.f32.mrb[11].mxu1 }
 0x975   :  { %4551 = vtanh.f32 %v884_v39 }
 0x97f   :  { %v4552_v42 = vpop.eup %4551 }
 0x980   :  { %3425 = vmatmul.mubr.msk.f32.vlgmr.msra.gmra.mrb[12].mxu1 %vm111_vm1, %v4552_v42 }
 0x981   :  { %4198 = vmatpush3.bf16.msra.mxu1 %v4839_v33  ;;  %3494 = vmatprep.mubr.msk.f32.mxu1 %vm4564_vm0, %v4565_v4 }
 0x982   :  { %4199 = vmatprep.subr.bf16.mxu1 %v4563_v0 }
 0x985   :  { %4201 = vmatpush3.bf16.msra.mxu1 %v4845_v35 }
 0x986   :  { %4202 = vmatprep.subr.bf16.mxu1 %v4563_v0 }
 0x989   :  { %4204 = vmatpush3.bf16.msra.mxu1 %v4855_v38 }
 0x98a   :  { %4205 = vmatprep.subr.bf16.mxu1 %v4563_v0 }
 0x98d   :  { %4207 = vmatpush3.bf16.msra.mxu1 %v4865_v41 }
 0x98e   :  { %4208 = vmatprep.subr.bf16.mxu1 %v4563_v0 }
 0x991   :  { %4210 = vmatpush3.bf16.msra.mxu1 %v4875_v44 }
 0x992   :  { %4211 = vmatprep.subr.bf16.mxu1 %v4563_v0 }
 0x995   :  { %4213 = vmatpush3.bf16.msra.mxu1 %v4885_v48 }
 0x996   :  { %4214 = vmatprep.subr.bf16.mxu1 %v4563_v0 }
 0x999   :  { %4216 = vmatpush3.bf16.msra.mxu1 %v4895_v53 }
 0x99a   :  { %4217 = vmatprep.subr.bf16.mxu1 %v4563_v0 }
 0x99d   :  { %4219 = vmatpush3.bf16.msra.mxu1 %v4919_v2 }
 0x99e   :  { %4235 = vmatprep.subr.bf16.mxu1 %v4563_v0 }
 0xa53   :  { %v957_v46 = vpop.f32.mrb[12].mxu1 }
 0xa54   :  { %v958_v47 = vadd.f32 %v957_v46, %v4903_v54  ;;  %v3426_v49 = vpop.f32.mrb[13].mxu1 }
 0xa56   :  { %v961_v50 = vmul.f32 %v2733_v43, %v958_v47 }
 0xa58   :  { %3460 = vmatmul.mubr.f32.vlgmr.msra.gmra.mrb[10].mxu0 %v961_v50 }
 0xa59   :  { %4222 = vmatpush3.bf16.msra.mxu0 %v4685_v45  ;;  %3501 = vmatprep.mubr.msk.f32.mxu0 %vm4564_vm0, %v4565_v4 }
 0xa5a   :  { %4223 = vmatprep.subr.bf16.mxu0 %v4563_v0 }
 0xb2b   :  { %v1028_v55 = vpop.f32.mrb[10].mxu0 }
 0xb2c   :  { %v1032_v57 = vmul.f32 %v1028_v55, %v958_v47  ;;  %v3461_v58 = vpop.f32.mrb[11].mxu0 }
 0xb2e   :  { %3495 = vmatmul.mubr.f32.vlgmr.msra.gmra.mrb[14].mxu1 %v1032_v57 }
 0xb2f   :  { %4237 = vmatpush3.bf16.msra.mxu1 %v4750_v3  ;;  %3555 = vmatprep.mubr.msk.f32.mxu1 %vm4564_vm0, %v4565_v4 }
 0xb30   :  { %4238 = vmatprep.subr.bf16.mxu1 %v4563_v0 }
 0xb33   :  { %4240 = vmatpush3.bf16.msra.mxu1 %v4756_v6 }
 0xb34   :  { %4241 = vmatprep.subr.bf16.mxu1 %v4563_v0 }
 0xb37   :  { %4243 = vmatpush3.bf16.msra.mxu1 %v4766_v9 }
 0xb38   :  { %4244 = vmatprep.subr.bf16.mxu1 %v4563_v0 }
 0xb3b   :  { %4246 = vmatpush3.bf16.msra.mxu1 %v4776_v12 }
 0xb3c   :  { %4247 = vmatprep.subr.bf16.mxu1 %v4563_v0 }
 0xb3f   :  { %4249 = vmatpush3.bf16.msra.mxu1 %v4786_v15 }
 0xb40   :  { %4250 = vmatprep.subr.bf16.mxu1 %v4563_v0 }
 0xb43   :  { %4252 = vmatpush3.bf16.msra.mxu1 %v4796_v18 }
 0xb44   :  { %4253 = vmatprep.subr.bf16.mxu1 %v4563_v0 }
 0xb47   :  { %4255 = vmatpush3.bf16.msra.mxu1 %v4806_v21 }
 0xb48   :  { %4256 = vmatprep.subr.bf16.mxu1 %v4563_v0 }
 0xb4b   :  { %4258 = vmatpush3.bf16.msra.mxu1 %v4826_v29 }
 0xb4c   :  { %4283 = vmatprep.subr.bf16.mxu1 %v4563_v0 }
 0xc01   :  { %v1099_v60 = vpop.f32.mrb[14].mxu1 }
 0xc02   :  { %v1100_v61 = vadd.f32 %v1099_v60, %v1028_v55  ;;  %v3496_v63 = vpop.f32.mrb[15].mxu1 }
 0xc04   :  { %v5064_v1 = vadd.f32 %v1100_v61, %v5003_v36  ;;  %v2742_v61 = vld [vmem:[%s5377_s0 + $0x30] sm:$0xff] }
 0xc06   :  { %3502 = vmatmul.mubr.msk.f32.vlgmr.msra.gmra.mrb[12].mxu0 %vm189_vm2, %v5064_v1 }
 0xc07   :  { %4225 = vmatpush3.bf16.msra.mxu0 %v4701_v51  ;;  %3520 = vmatprep.mubr.msk.f32.mxu0 %vm4564_vm0, %v4565_v4 }
 0xc08   :  { %4226 = vmatprep.subr.bf16.mxu0 %v4563_v0 }
 0xc0b   :  { %4228 = vmatpush3.bf16.msra.mxu0 %v4717_v56 }
 0xc0c   :  { %4229 = vmatprep.subr.bf16.mxu0 %v4563_v0 }
 0xc0f   :  { %4231 = vmatpush3.bf16.msra.mxu0 %v4727_v59 }
 0xc10   :  { %4232 = vmatprep.subr.bf16.mxu0 %v4563_v0 }
 0xc13   :  { %4234 = vmatpush3.bf16.msra.mxu0 %v4736_v62 }
 0xc14   :  { %4259 = vmatprep.subr.bf16.mxu0 %v4563_v0 }
 0xcd9   :  { %v1175_v5 = vpop.f32.mrb[12].mxu0 }
 0xcda   :  { %v1176_v7 = vadd.f32 %v1175_v5, %v4814_v22  ;;  %v3503_v8 = vpop.f32.mrb[13].mxu0 }
 0xcdc   :  { %4553 = vtanh.f32 %v1176_v7 }
 0xce6   :  { %v4554_v10 = vpop.eup %4553 }
 0xce7   :  { %3521 = vmatmul.mubr.msk.f32.vlgmr.msra.gmra.mrb[14].mxu0 %vm111_vm1, %v4554_v10 }
 0xce8   :  { %4261 = vmatpush3.bf16.msra.mxu0 %v4839_v33  ;;  %3590 = vmatprep.mubr.msk.f32.mxu0 %vm4564_vm0, %v4565_v4 }
 0xce9   :  { %4262 = vmatprep.subr.bf16.mxu0 %v4563_v0 }
 0xcec   :  { %4264 = vmatpush3.bf16.msra.mxu0 %v4845_v35 }
 0xced   :  { %4265 = vmatprep.subr.bf16.mxu0 %v4563_v0 }
 0xcf0   :  { %4267 = vmatpush3.bf16.msra.mxu0 %v4855_v38 }
 0xcf1   :  { %4268 = vmatprep.subr.bf16.mxu0 %v4563_v0 }
 0xcf4   :  { %4270 = vmatpush3.bf16.msra.mxu0 %v4865_v41 }
 0xcf5   :  { %4271 = vmatprep.subr.bf16.mxu0 %v4563_v0 }
 0xcf8   :  { %4273 = vmatpush3.bf16.msra.mxu0 %v4875_v44 }
 0xcf9   :  { %4274 = vmatprep.subr.bf16.mxu0 %v4563_v0 }
 0xcfc   :  { %4276 = vmatpush3.bf16.msra.mxu0 %v4885_v48 }
 0xcfd   :  { %4277 = vmatprep.subr.bf16.mxu0 %v4563_v0 }
 0xd00   :  { %4279 = vmatpush3.bf16.msra.mxu0 %v4895_v53 }
 0xd01   :  { %4280 = vmatprep.subr.bf16.mxu0 %v4563_v0 }
 0xd04   :  { %4282 = vmatpush3.bf16.msra.mxu0 %v4919_v2 }
 0xd05   :  { %4298 = vmatprep.subr.bf16.mxu0 %v4563_v0 }
 0xdba   :  { %v1249_v13 = vpop.f32.mrb[14].mxu0 }
 0xdbb   :  { %v1250_v14 = vadd.f32 %v1249_v13, %v4903_v54  ;;  %v3522_v52 = vpop.f32.mrb[15].mxu0 }
 0xdbd   :  { %v1253_v16 = vmul.f32 %v2736_v11, %v1250_v14 }
 0xdbf   :  { %3556 = vmatmul.mubr.f32.vlgmr.msra.gmra.mrb[16].mxu1 %v1253_v16 }
 0xdc0   :  { %4285 = vmatpush3.bf16.msra.mxu1 %v4685_v45  ;;  %3597 = vmatprep.mubr.msk.f32.mxu1 %vm4564_vm0, %v4565_v4 }
 0xdc1   :  { %4286 = vmatprep.subr.bf16.mxu1 %v4563_v0 }
 0xe92   :  { %v1320_v17 = vpop.f32.mrb[16].mxu1 }
 0xe93   :  { %v1324_v19 = vmul.f32 %v1320_v17, %v1250_v14  ;;  %v3557_v20 = vpop.f32.mrb[17].mxu1 }
 0xe95   :  { %3591 = vmatmul.mubr.f32.vlgmr.msra.gmra.mrb[16].mxu0 %v1324_v19 }
 0xe96   :  { %4300 = vmatpush3.bf16.msra.mxu0 %v4750_v3  ;;  %3651 = vmatprep.mubr.msk.f32.mxu0 %vm4564_vm0, %v4565_v4 }
 0xe97   :  { %4301 = vmatprep.subr.bf16.mxu0 %v4563_v0 }
 0xe9a   :  { %4303 = vmatpush3.bf16.msra.mxu0 %v4756_v6 }
 0xe9b   :  { %4304 = vmatprep.subr.bf16.mxu0 %v4563_v0 }
 0xe9e   :  { %4306 = vmatpush3.bf16.msra.mxu0 %v4766_v9 }
 0xe9f   :  { %4307 = vmatprep.subr.bf16.mxu0 %v4563_v0 }
 0xea2   :  { %4309 = vmatpush3.bf16.msra.mxu0 %v4776_v12 }
 0xea3   :  { %4310 = vmatprep.subr.bf16.mxu0 %v4563_v0 }
 0xea6   :  { %4312 = vmatpush3.bf16.msra.mxu0 %v4786_v15 }
 0xea7   :  { %4313 = vmatprep.subr.bf16.mxu0 %v4563_v0 }
 0xeaa   :  { %4315 = vmatpush3.bf16.msra.mxu0 %v4796_v18 }
 0xeab   :  { %4316 = vmatprep.subr.bf16.mxu0 %v4563_v0 }
 0xeae   :  { %4318 = vmatpush3.bf16.msra.mxu0 %v4806_v21 }
 0xeaf   :  { %4319 = vmatprep.subr.bf16.mxu0 %v4563_v0 }
 0xeb2   :  { %4321 = vmatpush3.bf16.msra.mxu0 %v4826_v29 }
 0xeb3   :  { %4346 = vmatprep.subr.bf16.mxu0 %v4563_v0 }
 0xf68   :  { %v1391_v23 = vpop.f32.mrb[16].mxu0 }
 0xf69   :  { %v1392_v24 = vadd.f32 %v1391_v23, %v1320_v17  ;;  %v3592_v25 = vpop.f32.mrb[17].mxu0 }
 0xf6b   :  { %v5125_v26 = vadd.f32 %v1392_v24, %v5064_v1  ;;  %v2745_v24 = vld [vmem:[%s5377_s0 + $0x38] sm:$0xff] }
 0xf6d   :  { %3598 = vmatmul.mubr.msk.f32.vlgmr.msra.gmra.mrb[18].mxu1 %vm189_vm2, %v5125_v26 }
 0xf6e   :  { %4288 = vmatpush3.bf16.msra.mxu1 %v4701_v51  ;;  %3616 = vmatprep.mubr.msk.f32.mxu1 %vm4564_vm0, %v4565_v4 }
 0xf6f   :  { %4289 = vmatprep.subr.bf16.mxu1 %v4563_v0 }
 0xf72   :  { %4291 = vmatpush3.bf16.msra.mxu1 %v4717_v56 }
 0xf73   :  { %4292 = vmatprep.subr.bf16.mxu1 %v4563_v0 }
 0xf76   :  { %4294 = vmatpush3.bf16.msra.mxu1 %v4727_v59 }
 0xf77   :  { %4295 = vmatprep.subr.bf16.mxu1 %v4563_v0 }
 0xf7a   :  { %4297 = vmatpush3.bf16.msra.mxu1 %v4736_v62 }
 0xf7b   :  { %4322 = vmatprep.subr.bf16.mxu1 %v4563_v0 }
0x1040   :  { %v1467_v27 = vpop.f32.mrb[18].mxu1 }
0x1041   :  { %v1468_v28 = vadd.f32 %v1467_v27, %v4814_v22  ;;  %v3599_v30 = vpop.f32.mrb[19].mxu1 }
0x1043   :  { %4555 = vtanh.f32 %v1468_v28 }
0x104d   :  { %v4556_v31 = vpop.eup %4555 }
0x104e   :  { %3617 = vmatmul.mubr.msk.f32.vlgmr.msra.gmra.mrb[20].mxu1 %vm111_vm1, %v4556_v31 }
0x104f   :  { %4324 = vmatpush3.bf16.msra.mxu1 %v4839_v33  ;;  %3686 = vmatprep.mubr.msk.f32.mxu1 %vm4564_vm0, %v4565_v4 }
0x1050   :  { %4325 = vmatprep.subr.bf16.mxu1 %v4563_v0 }
0x1053   :  { %4327 = vmatpush3.bf16.msra.mxu1 %v4845_v35 }
0x1054   :  { %4328 = vmatprep.subr.bf16.mxu1 %v4563_v0 }
0x1057   :  { %4330 = vmatpush3.bf16.msra.mxu1 %v4855_v38 }
0x1058   :  { %4331 = vmatprep.subr.bf16.mxu1 %v4563_v0 }
0x105b   :  { %4333 = vmatpush3.bf16.msra.mxu1 %v4865_v41 }
0x105c   :  { %4334 = vmatprep.subr.bf16.mxu1 %v4563_v0 }
0x105f   :  { %4336 = vmatpush3.bf16.msra.mxu1 %v4875_v44 }
0x1060   :  { %4337 = vmatprep.subr.bf16.mxu1 %v4563_v0 }
0x1063   :  { %4339 = vmatpush3.bf16.msra.mxu1 %v4885_v48 }
0x1064   :  { %4340 = vmatprep.subr.bf16.mxu1 %v4563_v0 }
0x1067   :  { %4342 = vmatpush3.bf16.msra.mxu1 %v4895_v53 }
0x1068   :  { %4343 = vmatprep.subr.bf16.mxu1 %v4563_v0 }
0x106b   :  { %4345 = vmatpush3.bf16.msra.mxu1 %v4919_v2 }
0x106c   :  { %4361 = vmatprep.subr.bf16.mxu1 %v4563_v0 }
0x1121   :  { %v1541_v34 = vpop.f32.mrb[20].mxu1 }
0x1122   :  { %v1542_v36 = vadd.f32 %v1541_v34, %v4903_v54  ;;  %v3618_v37 = vpop.f32.mrb[21].mxu1 }
0x1124   :  { %v1545_v39 = vmul.f32 %v2739_v32, %v1542_v36 }
0x1126   :  { %3652 = vmatmul.mubr.f32.vlgmr.msra.gmra.mrb[18].mxu0 %v1545_v39  ;;  %v2643_v39 = vld [vmem:[%s5376_s1 + $0x230] sm:$0xff] }
0x1127   :  { %4348 = vmatpush3.bf16.msra.mxu0 %v4685_v45  ;;  %3693 = vmatprep.mubr.msk.f32.mxu0 %vm4564_vm0, %v4565_v4 }
0x1128   :  { %4349 = vmatprep.subr.bf16.mxu0 %v4563_v0 }
0x11f9   :  { %v1612_v40 = vpop.f32.mrb[18].mxu0 }
0x11fa   :  { %v1616_v42 = vmul.f32 %v1612_v40, %v1542_v36  ;;  %v3653_v43 = vpop.f32.mrb[19].mxu0 }
0x11fb   :  { %v2566_v43 = vld [vmem:[%s5376_s1 + $0x260] sm:$0xff] }
0x11fc   :  { %3687 = vmatmul.mubr.f32.vlgmr.msra.gmra.mrb[22].mxu1 %v1616_v42 }
0x11fd   :  { %4363 = vmatpush3.bf16.msra.mxu1 %v4750_v3  ;;  %3747 = vmatprep.mubr.msk.f32.mxu1 %vm4564_vm0, %v4565_v4 }
0x11fe   :  { %4364 = vmatprep.subr.bf16.mxu1 %v4563_v0 }
0x1201   :  { %4366 = vmatpush3.bf16.msra.mxu1 %v4756_v6 }
0x1202   :  { %4367 = vmatprep.subr.bf16.mxu1 %v4563_v0 }
0x1205   :  { %4369 = vmatpush3.bf16.msra.mxu1 %v4766_v9 }
0x1206   :  { %4370 = vmatprep.subr.bf16.mxu1 %v4563_v0 }
0x1209   :  { %4372 = vmatpush3.bf16.msra.mxu1 %v4776_v12 }
0x120a   :  { %4373 = vmatprep.subr.bf16.mxu1 %v4563_v0 }
0x120d   :  { %4375 = vmatpush3.bf16.msra.mxu1 %v4786_v15 }
0x120e   :  { %4376 = vmatprep.subr.bf16.mxu1 %v4563_v0 }
0x1211   :  { %4378 = vmatpush3.bf16.msra.mxu1 %v4796_v18 }
0x1212   :  { %4379 = vmatprep.subr.bf16.mxu1 %v4563_v0 }
0x1215   :  { %4381 = vmatpush3.bf16.msra.mxu1 %v4806_v21 }
0x1216   :  { %4382 = vmatprep.subr.bf16.mxu1 %v4563_v0 }
0x1219   :  { %4384 = vmatpush3.bf16.msra.mxu1 %v4826_v29 }
0x121a   :  { %4409 = vmatprep.subr.bf16.mxu1 %v4563_v0 }
0x12cf   :  { %v1683_v46 = vpop.f32.mrb[22].mxu1 }
0x12d0   :  { %v1684_v47 = vadd.f32 %v1683_v46, %v1612_v40  ;;  %v3688_v49 = vpop.f32.mrb[23].mxu1  ;;  %v2644_v40 = vld [vmem:[%s5376_s1 + $0x238] sm:$0xff] }
0x12d1   :  { %v4542_v42 = vpack.c.bf16 %v2644_v40, %v2643_v39 }
0x12d2   :  { %v5186_v50 = vadd.f32 %v1684_v47, %v5125_v26 }
0x12d4   :  { %3694 = vmatmul.mubr.msk.f32.vlgmr.msra.gmra.mrb[20].mxu0 %vm189_vm2, %v5186_v50 }
0x12d5   :  { %4351 = vmatpush3.bf16.msra.mxu0 %v4701_v51  ;;  %3712 = vmatprep.mubr.msk.f32.mxu0 %vm4564_vm0, %v4565_v4 }
0x12d6   :  { %4352 = vmatprep.subr.bf16.mxu0 %v4563_v0 }
0x12d9   :  { %4354 = vmatpush3.bf16.msra.mxu0 %v4717_v56 }
0x12da   :  { %4355 = vmatprep.subr.bf16.mxu0 %v4563_v0 }
0x12dd   :  { %4357 = vmatpush3.bf16.msra.mxu0 %v4727_v59 }
0x12de   :  { %4358 = vmatprep.subr.bf16.mxu0 %v4563_v0 }
0x12e1   :  { %4360 = vmatpush3.bf16.msra.mxu0 %v4736_v62 }
0x12e2   :  { %4385 = vmatprep.subr.bf16.mxu0 %v4563_v0 }
0x13a7   :  { %v1759_v55 = vpop.f32.mrb[20].mxu0 }
0x13a8   :  { %v1760_v57 = vadd.f32 %v1759_v55, %v4814_v22  ;;  %v3695_v58 = vpop.f32.mrb[21].mxu0 }
0x13aa   :  { %4557 = vtanh.f32 %v1760_v57 }
0x13b4   :  { %v4558_v60 = vpop.eup %4557 }
0x13b5   :  { %3713 = vmatmul.mubr.msk.f32.vlgmr.msra.gmra.mrb[22].mxu0 %vm111_vm1, %v4558_v60 }
0x13b6   :  { %4387 = vmatpush3.bf16.msra.mxu0 %v4839_v33  ;;  %3782 = vmatprep.mubr.msk.f32.mxu0 %vm4564_vm0, %v4565_v4 }
0x13b7   :  { %4388 = vmatprep.subr.bf16.mxu0 %v4563_v0 }
0x13ba   :  { %4390 = vmatpush3.bf16.msra.mxu0 %v4845_v35 }
0x13bb   :  { %4391 = vmatprep.subr.bf16.mxu0 %v4563_v0 }
0x13be   :  { %4393 = vmatpush3.bf16.msra.mxu0 %v4855_v38 }
0x13bf   :  { %4394 = vmatprep.subr.bf16.mxu0 %v4563_v0 }
0x13c2   :  { %4396 = vmatpush3.bf16.msra.mxu0 %v4865_v41 }
0x13c3   :  { %4397 = vmatprep.subr.bf16.mxu0 %v4563_v0 }
0x13c6   :  { %4399 = vmatpush3.bf16.msra.mxu0 %v4875_v44 }
0x13c7   :  { %4400 = vmatprep.subr.bf16.mxu0 %v4563_v0 }
0x13ca   :  { %4402 = vmatpush3.bf16.msra.mxu0 %v4885_v48 }
0x13cb   :  { %4403 = vmatprep.subr.bf16.mxu0 %v4563_v0 }
0x13ce   :  { %4405 = vmatpush3.bf16.msra.mxu0 %v4895_v53 }
0x13cf   :  { %4406 = vmatprep.subr.bf16.mxu0 %v4563_v0 }
0x13d2   :  { %4408 = vmatpush3.bf16.msra.mxu0 %v4919_v2 }
0x13d3   :  { %4424 = vmatprep.subr.bf16.mxu0 %v4563_v0 }
0x1488   :  { %v1833_v63 = vpop.f32.mrb[22].mxu0 }
0x1489   :  { %v1834_v1 = vadd.f32 %v1833_v63, %v4903_v54  ;;  %v3714_v5 = vpop.f32.mrb[23].mxu0 }
0x148b   :  { %v1837_v7 = vmul.f32 %v2742_v61, %v1834_v1 }
0x148d   :  { %3748 = vmatmul.mubr.f32.vlgmr.msra.gmra.mrb[24].mxu1 %v1837_v7 }
0x148e   :  { %4411 = vmatpush3.bf16.msra.mxu1 %v4685_v45  ;;  %3789 = vmatprep.mubr.msk.f32.mxu1 %vm4564_vm0, %v4565_v4 }
0x148f   :  { %4412 = vmatprep.subr.bf16.mxu1 %v4563_v0 }
0x1560   :  { %v1904_v8 = vpop.f32.mrb[24].mxu1 }
0x1561   :  { %v1908_v10 = vmul.f32 %v1904_v8, %v1834_v1  ;;  %v3749_v11 = vpop.f32.mrb[25].mxu1 }
0x1563   :  { %3783 = vmatmul.mubr.f32.vlgmr.msra.gmra.mrb[24].mxu0 %v1908_v10 }
0x1564   :  { %4426 = vmatpush3.bf16.msra.mxu0 %v4750_v3  ;;  %3843 = vmatprep.mubr.msk.f32.mxu0 %vm4564_vm0, %v4565_v4 }
0x1565   :  { %4427 = vmatprep.subr.bf16.mxu0 %v4563_v0 }
0x1568   :  { %4429 = vmatpush3.bf16.msra.mxu0 %v4756_v6 }
0x1569   :  { %4430 = vmatprep.subr.bf16.mxu0 %v4563_v0 }
0x156c   :  { %4432 = vmatpush3.bf16.msra.mxu0 %v4766_v9 }
0x156d   :  { %4433 = vmatprep.subr.bf16.mxu0 %v4563_v0 }
0x1570   :  { %4435 = vmatpush3.bf16.msra.mxu0 %v4776_v12 }
0x1571   :  { %4436 = vmatprep.subr.bf16.mxu0 %v4563_v0 }
0x1574   :  { %4438 = vmatpush3.bf16.msra.mxu0 %v4786_v15 }
0x1575   :  { %4439 = vmatprep.subr.bf16.mxu0 %v4563_v0 }
0x1578   :  { %4441 = vmatpush3.bf16.msra.mxu0 %v4796_v18 }
0x1579   :  { %4442 = vmatprep.subr.bf16.mxu0 %v4563_v0 }
0x157c   :  { %4444 = vmatpush3.bf16.msra.mxu0 %v4806_v21 }
0x157d   :  { %4445 = vmatprep.subr.bf16.mxu0 %v4563_v0 }
0x1580   :  { %4447 = vmatpush3.bf16.msra.mxu0 %v4826_v29 }
0x1581   :  { %4472 = vmatprep.subr.bf16.mxu0 %v4563_v0 }
0x1636   :  { %v1975_v13 = vpop.f32.mrb[24].mxu0 }
0x1637   :  { %v1976_v14 = vadd.f32 %v1975_v13, %v1904_v8  ;;  %v3784_v52 = vpop.f32.mrb[25].mxu0 }
0x1639   :  { %v5247_v16 = vadd.f32 %v1976_v14, %v5186_v50 }
0x163b   :  { %3790 = vmatmul.mubr.msk.f32.vlgmr.msra.gmra.mrb[26].mxu1 %vm189_vm2, %v5247_v16 }
0x163c   :  { %4414 = vmatpush3.bf16.msra.mxu1 %v4701_v51  ;;  %3808 = vmatprep.mubr.msk.f32.mxu1 %vm4564_vm0, %v4565_v4 }
0x163d   :  { %4415 = vmatprep.subr.bf16.mxu1 %v4563_v0 }
0x1640   :  { %4417 = vmatpush3.bf16.msra.mxu1 %v4717_v56 }
0x1641   :  { %4418 = vmatprep.subr.bf16.mxu1 %v4563_v0 }
0x1644   :  { %4420 = vmatpush3.bf16.msra.mxu1 %v4727_v59 }
0x1645   :  { %4421 = vmatprep.subr.bf16.mxu1 %v4563_v0 }
0x1648   :  { %4423 = vmatpush3.bf16.msra.mxu1 %v4736_v62 }
0x1649   :  { %4448 = vmatprep.subr.bf16.mxu1 %v4563_v0 }
0x170e   :  { %v2051_v17 = vpop.f32.mrb[26].mxu1 }
0x170f   :  { %v2052_v19 = vadd.f32 %v2051_v17, %v4814_v22  ;;  %v3791_v20 = vpop.f32.mrb[27].mxu1 }
0x1711   :  { %4559 = vtanh.f32 %v2052_v19 }
0x171b   :  { %v4560_v23 = vpop.eup %4559 }
0x171c   :  { %3809 = vmatmul.mubr.msk.f32.vlgmr.msra.gmra.mrb[28].mxu1 %vm111_vm1, %v4560_v23 }
0x171d   :  { %4450 = vmatpush3.bf16.msra.mxu1 %v4839_v33  ;;  %3878 = vmatprep.mubr.msk.f32.mxu1 %vm4564_vm0, %v4565_v4 }
0x171e   :  { %4451 = vmatprep.subr.bf16.mxu1 %v4563_v0 }
0x1721   :  { %4453 = vmatpush3.bf16.msra.mxu1 %v4845_v35 }
0x1722   :  { %4454 = vmatprep.subr.bf16.mxu1 %v4563_v0 }
0x1725   :  { %4456 = vmatpush3.bf16.msra.mxu1 %v4855_v38 }
0x1726   :  { %4457 = vmatprep.subr.bf16.mxu1 %v4563_v0 }
0x1729   :  { %4459 = vmatpush3.bf16.msra.mxu1 %v4865_v41 }
0x172a   :  { %4460 = vmatprep.subr.bf16.mxu1 %v4563_v0 }
0x172d   :  { %4462 = vmatpush3.bf16.msra.mxu1 %v4875_v44 }
0x172e   :  { %4463 = vmatprep.subr.bf16.mxu1 %v4563_v0 }
0x1731   :  { %4465 = vmatpush3.bf16.msra.mxu1 %v4885_v48 }
0x1732   :  { %4466 = vmatprep.subr.bf16.mxu1 %v4563_v0 }
0x1735   :  { %4468 = vmatpush3.bf16.msra.mxu1 %v4895_v53 }
0x1736   :  { %4469 = vmatprep.subr.bf16.mxu1 %v4563_v0 }
0x1739   :  { %4471 = vmatpush3.bf16.msra.mxu1 %v4919_v2 }
0x173a   :  { %4487 = vmatprep.subr.bf16.mxu1 %v4563_v0 }
0x17ef   :  { %v2125_v25 = vpop.f32.mrb[28].mxu1 }
0x17f0   :  { %v2126_v26 = vadd.f32 %v2125_v25, %v4903_v54  ;;  %v3810_v27 = vpop.f32.mrb[29].mxu1 }
0x17f2   :  { %v2129_v28 = vmul.f32 %v2745_v24, %v2126_v26 }
0x17f4   :  { %3844 = vmatmul.mubr.f32.vlgmr.msra.gmra.mrb[26].mxu0 %v2129_v28 }
0x17f5   :  { %4474 = vmatpush3.bf16.msra.mxu0 %v4685_v45  ;;  %3885 = vmatprep.mubr.msk.f32.mxu0 %vm4564_vm0, %v4565_v4 }
0x17f6   :  { %4475 = vmatprep.subr.bf16.mxu0 %v4563_v0 }
0x18c7   :  { %v2196_v30 = vpop.f32.mrb[26].mxu0 }
0x18c8   :  { %v2200_v31 = vmul.f32 %v2196_v30, %v2126_v26  ;;  %v3845_v32 = vpop.f32.mrb[27].mxu0 }
0x18ca   :  { %3879 = vmatmul.mubr.f32.vlgmr.msra.gmra.mrb[30].mxu1 %v2200_v31 }
0x18cb   :  { %4489 = vmatpush3.bf16.msra.mxu1 %v4750_v3  ;;  %3939 = vmatprep.mubr.msk.f32.mxu1 %vm4564_vm0, %v4565_v4 }
0x18cc   :  { %4490 = vmatprep.subr.bf16.mxu1 %v4563_v0 }
0x18cf   :  { %4492 = vmatpush3.bf16.msra.mxu1 %v4756_v6 }
0x18d0   :  { %4493 = vmatprep.subr.bf16.mxu1 %v4563_v0 }
0x18d3   :  { %4495 = vmatpush3.bf16.msra.mxu1 %v4766_v9 }
0x18d4   :  { %4496 = vmatprep.subr.bf16.mxu1 %v4563_v0 }
0x18d7   :  { %4498 = vmatpush3.bf16.msra.mxu1 %v4776_v12 }
0x18d8   :  { %4499 = vmatprep.subr.bf16.mxu1 %v4563_v0 }
0x18db   :  { %4501 = vmatpush3.bf16.msra.mxu1 %v4786_v15 }
0x18dc   :  { %4502 = vmatprep.subr.bf16.mxu1 %v4563_v0 }
0x18df   :  { %4504 = vmatpush3.bf16.msra.mxu1 %v4796_v18 }
0x18e0   :  { %4505 = vmatprep.subr.bf16.mxu1 %v4563_v0 }
0x18e3   :  { %4507 = vmatpush3.bf16.msra.mxu1 %v4806_v21 }
0x18e4   :  { %4508 = vmatprep.subr.bf16.mxu1 %v4563_v0 }
0x18e7   :  { %4510 = vmatpush3.bf16.msra.mxu1 %v4826_v29 }
0x18e8   :  { %4535 = vmatprep.subr.bf16.mxu1 %v4563_v0 }
0x199d   :  { %v2267_v45 = vpop.f32.mrb[30].mxu1 }
0x199e   :  { %v2268_v3 = vadd.f32 %v2267_v45, %v2196_v30  ;;  %v3880_v6 = vpop.f32.mrb[31].mxu1 }
0x19a0   :  { %v2271_v9 = vadd.f32 %v2268_v3, %v5247_v16 }
0x19a2   :  { %3886 = vmatmul.mubr.msk.f32.vlgmr.msra.gmra.mrb[28].mxu0 %vm189_vm2, %v2271_v9 }
0x19a3   :  { %4477 = vmatpush3.bf16.msra.mxu0 %v4701_v51  ;;  %3904 = vmatprep.mubr.msk.f32.mxu0 %vm4564_vm0, %v4565_v4 }
0x19a4   :  { %4478 = vmatprep.subr.bf16.mxu0 %v4563_v0 }
0x19a7   :  { %4480 = vmatpush3.bf16.msra.mxu0 %v4717_v56  ;;  %v2748_v56 = vld [vmem:[%s5377_s0 + $0x40] sm:$0xff] }
0x19a8   :  { %4481 = vmatprep.subr.bf16.mxu0 %v4563_v0 }
0x19ab   :  { %4483 = vmatpush3.bf16.msra.mxu0 %v4727_v59 }
0x19ac   :  { %4484 = vmatprep.subr.bf16.mxu0 %v4563_v0 }
0x19af   :  { %4486 = vmatpush3.bf16.msra.mxu0 %v4736_v62 }
0x19b0   :  { %4511 = vmatprep.subr.bf16.mxu0 %v4563_v0 }
0x1a75   :  { %v2343_v12 = vpop.f32.mrb[28].mxu0 }
0x1a76   :  { %v2344_v51 = vadd.f32 %v2343_v12, %v4814_v22  ;;  %v3887_v15 = vpop.f32.mrb[29].mxu0 }
0x1a78   :  { %4561 = vtanh.f32 %v2344_v51 }
0x1a82   :  { %v4562_v18 = vpop.eup %4561 }
0x1a83   :  { %3905 = vmatmul.mubr.msk.f32.vlgmr.msra.gmra.mrb[30].mxu0 %vm111_vm1, %v4562_v18 }
0x1a84   :  { %4513 = vmatpush3.bf16.msra.mxu0 %v4839_v33  ;;  %3974 = vmatprep.mubr.msk.f32.mxu0 %vm4564_vm0, %v4565_v4 }
0x1a85   :  { %4514 = vmatprep.subr.bf16.mxu0 %v4563_v0 }
0x1a88   :  { %4516 = vmatpush3.bf16.msra.mxu0 %v4845_v35 }
0x1a89   :  { %4517 = vmatprep.subr.bf16.mxu0 %v4563_v0 }
0x1a8c   :  { %4519 = vmatpush3.bf16.msra.mxu0 %v4855_v38  ;;  %v2564_v38 = vld [vmem:[%s5376_s1 + $0x210] sm:$0xff] }
0x1a8d   :  { %4520 = vmatprep.subr.bf16.mxu0 %v4563_v0 }
0x1a90   :  { %4522 = vmatpush3.bf16.msra.mxu0 %v4865_v41  ;;  %v2565_v41 = vld [vmem:[%s5376_s1 + $0x218] sm:$0xff] }
0x1a91   :  { %4523 = vmatprep.subr.bf16.mxu0 %v4563_v0 }
0x1a94   :  { %4525 = vmatpush3.bf16.msra.mxu0 %v4875_v44  ;;  %v4536_v44 = vpack.c.bf16 %v2565_v41, %v2564_v38 }
0x1a95   :  { %4526 = vmatprep.subr.bf16.mxu0 %v4563_v0 }
0x1a98   :  { %4528 = vmatpush3.bf16.msra.mxu0 %v4885_v48  ;;  %v2641_v48 = vld [vmem:[%s5376_s1 + $0x220] sm:$0xff] }
0x1a99   :  { %4529 = vmatprep.subr.bf16.mxu0 %v4563_v0 }
0x1a9c   :  { %4531 = vmatpush3.bf16.msra.mxu0 %v4895_v53  ;;  %v2642_v53 = vld [vmem:[%s5376_s1 + $0x228] sm:$0xff] }
0x1a9d   :  { %4532 = vmatprep.subr.bf16.mxu0 %v4563_v0  ;;  %v4539_v36 = vpack.c.bf16 %v2642_v53, %v2641_v48 }
0x1aa0   :  { %4534 = vmatpush3.bf16.msra.mxu0 %v4919_v2 }
0x1b56   :  { %v2417_v59 = vpop.f32.mrb[30].mxu0 }
0x1b57   :  { %v2418_v62 = vadd.f32 %v2417_v59, %v4903_v54  ;;  %v3906_v21 = vpop.f32.mrb[31].mxu0 }
0x1b59   :  { %v2421_v22 = vmul.f32 %v2748_v56, %v2418_v62 }
0x1b5b   :  { %3940 = vmatmul.mubr.f32.vlgmr.msra.gmra.mrb[32].mxu1 %v2421_v22 }
0x1b5c   :  { %3981 = vmatprep.mubr.msk.f32.mxu1 %vm4564_vm0, %v4565_v4  ;;  %4537 = vmatpush3.bf16.msra.mxu1 %v4536_v44 }
0x1b5d   :  { %4538 = vmatprep.subr.bf16.mxu1 %v4563_v0 }
0x1c2e   :  { %v2488_v29 = vpop.f32.mrb[32].mxu1 }
0x1c2f   :  { %v2492_v33 = vmul.f32 %v2488_v29, %v2418_v62  ;;  %v3941_v35 = vpop.f32.mrb[33].mxu1 }
0x1c31   :  { %3975 = vmatmul.mubr.f32.vlgmr.msra.gmra.mrb[32].mxu0 %v2492_v33 }
0x1d04   :  { %v2559_v54 = vpop.f32.mrb[32].mxu0 }
0x1d05   :  { %v2560_v2 = vadd.f32 %v2559_v54, %v2488_v29  ;;  %v3976_v34 = vpop.f32.mrb[33].mxu0 }
0x1d07   :  { %v2563_v37 = vadd.f32 %v2560_v2, %v2271_v9 }
0x1d09   :  { %3982 = vmatmul.mubr.msk.f32.vlgmr.msra.gmra.mrb[34].mxu1 %vm189_vm2, %v2563_v37 }
0x1d0a   :  { %4540 = vmatpush3.bf16.msra.mxu1 %v4539_v36  ;;  %3992 = vmatprep.mubr.msk.f32.mxu1 %vm4564_vm0, %v4565_v4 }
0x1d0b   :  { %4541 = vmatprep.subr.bf16.mxu1 %v4563_v0  ;;  %v2645_v0 = vld [vmem:[%s5376_s1 + $0x268] sm:$0xff] }
0x1d0e   :  { %4543 = vmatpush3.bf16.msra.mxu1 %v4542_v42 }
0x1ddc   :  { %v2636_v46 = vpop.f32.mrb[34].mxu1 }
0x1ddd   :  { %v2637_v47 = vadd.f32 %v2636_v46, %v2566_v43  ;;  %v3983_v49 = vpop.f32.mrb[35].mxu1 }
0x1ddf   :  { %v2640_v4 = vmax.f32 %v2637_v47, 0.0 }
0x1de1   :  { %3993 = vmatmul.mubr.msk.f32.vlgmr.msra.gmra.mrb[36].mxu1 %vm2646_vm3, %v2640_v4 }
0x1eb4   :  { %v2716_v50 = vpop.f32.mrb[36].mxu1 }
0x1eb5   :  { %v2717_v55 = vadd.f32 %v2716_v50, %v2645_v0  ;;  %v3994_v57 = vpop.f32.mrb[37].mxu1 }
0x1eb7   :  { %2721 = vst.msk [vmem:[%s5378_s2] sm:$0xff] %vm2720_vm4, %v2717_v55 }

</bundles_post_ra>
